<compile_context>
chip_gen: v7x
topology: tpu7x:2x2x1
jax: 0.10.0
libtpu: 0.0.40
codegen_flags: <defaults>
</compile_context>

<pallas_src>
import functools
import math

import jax
import jax.numpy as jnp
import numpy as np
from jax.experimental import pallas as pl
from jax.experimental.pallas import tpu as pltpu

# ---- configuration (PyTorch module defaults: d_ff=4*d_model, moving_avg=25, relu) ----
BATCH = 2
SEQ_LEN = 16
D_MODEL = 32
N_HEADS = 8
D_FF = 4 * D_MODEL          # nn module default: d_ff=None -> 4*d_model
MOVING_AVG = 25             # nn module default
ACTIVATION = "relu"         # nn module default ("gelu" also supported)
LN_EPS = 1e-5               # nn.LayerNorm default


def _layer_norm(z, gamma, beta, eps=LN_EPS):
    mu = jnp.mean(z, axis=-1, keepdims=True)
    var = jnp.mean(jnp.square(z - mu), axis=-1, keepdims=True)
    return (z - mu) * jax.lax.rsqrt(var + eps) * gamma + beta


# --------------------------------------------------------------------------------------
# Constant matrices folded into the kernel (built once at trace time on the host).
# --------------------------------------------------------------------------------------

def _build_moving_avg_matrix(seq_len, kernel_size):
    """[L, L] matrix M with (M @ x) == SeriesDecomp moving average (reflect pad + avg_pool1d)."""
    pad = (kernel_size - 1) // 2
    assert pad < seq_len, "reflect padding requires pad < seq_len (same constraint as torch)"
    mat = np.zeros((seq_len, seq_len), np.float32)
    for t in range(seq_len):
        for delta in range(-pad, pad + 1):
            i = t + delta
            if i < 0:
                i = -i
            elif i >= seq_len:
                i = 2 * (seq_len - 1) - i
            mat[t, i] += 1.0 / kernel_size
    return mat


def _build_delay_select_matrices(d_model, head_dim):
    """sel[d]: [D, D] one-hot matrix; (corr @ sel[d])[:, j] == corr[:, head(j)*head_dim + d]."""
    sel = np.zeros((head_dim, d_model, d_model), np.float32)
    for j in range(d_model):
        h = j // head_dim
        for d in range(head_dim):
            sel[d, h * head_dim + d, j] = 1.0
    return sel


# --------------------------------------------------------------------------------------
# Fused per-batch-element encoder-layer kernel.
# --------------------------------------------------------------------------------------

def _encoder_layer_kernel(x_ref, ma_ref, sel_ref,
                          fc1w_ref, fc1b_ref, fc2w_ref, fc2b_ref,
                          ln1g_ref, ln1b_ref, ln2g_ref, ln2b_ref, ln3g_ref, ln3b_ref,
                          o_ref, *, seq_len, head_dim, top_k, activation, eps):
    f32 = jnp.float32
    L = seq_len

    x = x_ref[...]                          # [L, D]
    ma = ma_ref[...]                        # [L, L] moving-average operator

    # ---- series_decomp(x): one MXU matmul instead of a k-tap unrolled window ----------
    trend = jnp.dot(ma, x, preferred_element_type=f32)
    seasonal = x - trend

    # ---- AutoCorrelation(seasonal, seasonal, seasonal) ---------------------------------
    # Direct circular correlation, identical to irfft(rfft(q) * conj(rfft(k)), n=L):
    #   corr[tau, d] = sum_s seasonal[s, d] * seasonal[(s - tau) % L, d]
    sdbl = jnp.concatenate([seasonal, seasonal], axis=0)            # [2L, D]
    row_ids = jax.lax.broadcasted_iota(jnp.int32, (L, x.shape[-1]), 0)
    corr = jnp.zeros_like(seasonal)
    for tau in range(L):
        shifted = sdbl[L - tau:2 * L - tau, :]                      # seasonal[(s - tau) % L]
        r = jnp.sum(seasonal * shifted, axis=0, keepdims=True)      # [1, D]
        corr = corr + jnp.where(row_ids == tau, r, 0.0)

    # Reference takes top-k of corr over its LAST axis (the head_dim channel axis) and
    # uses the winning channel indices as time delays.  Enumerate all head_dim candidate
    # delays; sel_ref[d] broadcasts channel d of every head across that head's 4 lanes so
    # everything stays in the [L, D] lane layout (one small MXU matmul per candidate).
    chan = [jnp.dot(corr, sel_ref[d], preferred_element_type=f32)
            for d in range(head_dim)]                               # each [L, D]
    masked = list(chan)
    tops, picks = [], []
    for _ in range(top_k):
        m = masked[0]
        for d in range(1, head_dim):
            m = jnp.maximum(m, masked[d])
        sel = [masked[d] == m for d in range(head_dim)]
        masked = [jnp.where(sel[d], -1e30, masked[d]) for d in range(head_dim)]
        tops.append(m)
        picks.append(sel)
    # softmax over the selected top-k correlation values
    exps = [jnp.exp(t - tops[0]) for t in tops]                     # exps[0] == 1
    denom = exps[0]
    for e in exps[1:]:
        denom = denom + e
    weights = [e / denom for e in exps]

    # time-delay aggregation: new_x[tau] = sum_d W_d[tau] * seasonal[(tau - d) % L]
    new_x = jnp.zeros_like(seasonal)
    for d in range(head_dim):
        w_d = jnp.zeros_like(seasonal)
        for i in range(top_k):
            w_d = w_d + jnp.where(picks[i][d], weights[i], 0.0)
        new_x = new_x + w_d * sdbl[L - d:2 * L - d, :]

    # ---- x = norm1(seasonal + new_x) ---------------------------------------------------
    # TODO(synk): train-mode nn.Dropout (torch RNG) is not implemented; eval semantics.
    x1 = _layer_norm(seasonal + new_x, ln1g_ref[...], ln1b_ref[...], eps)

    # ---- y = fc2(act(fc1(x)));  x = norm2(x + y) ---------------------------------------
    y = jnp.dot(x1, fc1w_ref[...], preferred_element_type=f32) + fc1b_ref[...]
    if activation == "gelu":
        y = jax.nn.gelu(y, approximate=False)        # torch.nn.GELU()
    else:
        y = jnp.maximum(y, 0.0)                      # torch.nn.ReLU()
    y = jnp.dot(y, fc2w_ref[...], preferred_element_type=f32) + fc2b_ref[...]
    x2 = _layer_norm(x1 + y, ln2g_ref[...], ln2b_ref[...], eps)

    # ---- residual = trend + x;  x, _ = decomp(residual);  out = norm3(x) --------------
    residual = trend + x2
    x3 = residual - jnp.dot(ma, residual, preferred_element_type=f32)
    o_ref[...] = _layer_norm(x3, ln3g_ref[...], ln3b_ref[...], eps)


# --------------------------------------------------------------------------------------
# Wrapper: one pallas_call for the whole layer, grid over the batch dimension.
# --------------------------------------------------------------------------------------

def autoformer_encoder_layer(x, params, *, n_heads=N_HEADS, moving_avg=MOVING_AVG,
                             activation=ACTIVATION, factor=1, eps=LN_EPS):
    """AutoformerEncoderLayer.forward; returns the layer output (attn output is None)."""
    batch, seq_len, d_model = x.shape
    assert d_model % n_heads == 0
    head_dim = d_model // n_heads
    top_k = max(1, int(factor * math.log(seq_len)))
    assert top_k <= head_dim, "in-kernel selection enumerates head_dim delay channels"
    assert head_dim <= seq_len
    d_ff = params["fc1_w"].shape[1]

    ma = jnp.asarray(_build_moving_avg_matrix(seq_len, moving_avg))
    sel = jnp.asarray(_build_delay_select_matrices(d_model, head_dim))

    kernel = functools.partial(_encoder_layer_kernel, seq_len=seq_len, head_dim=head_dim,
                               top_k=top_k, activation=activation, eps=eps)

    whole2 = lambda i: (0, 0)
    whole3 = lambda i: (0, 0, 0)
    vec = pl.BlockSpec((1, d_model), whole2)
    in_specs = [
        pl.BlockSpec((None, seq_len, d_model), lambda i: (i, 0, 0)),   # x[i]
        pl.BlockSpec((seq_len, seq_len), whole2),                      # moving-average matrix
        pl.BlockSpec((head_dim, d_model, d_model), whole3),            # delay-channel selectors
        pl.BlockSpec((d_model, d_ff), whole2),                         # fc1 weight
        pl.BlockSpec((1, d_ff), whole2),                               # fc1 bias
        pl.BlockSpec((d_ff, d_model), whole2),                         # fc2 weight
        vec,                                                           # fc2 bias
        vec, vec,                                                      # norm1 gamma / beta
        vec, vec,                                                      # norm2 gamma / beta
        vec, vec,                                                      # norm3 gamma / beta
    ]
    out_specs = pl.BlockSpec((None, seq_len, d_model), lambda i: (i, 0, 0))

    return pl.pallas_call(
        kernel,
        out_shape=jax.ShapeDtypeStruct((batch, seq_len, d_model), jnp.float32),
        grid=(batch,),                                   # one program per batch element
        in_specs=in_specs,
        out_specs=out_specs,
        compiler_params=pltpu.CompilerParams(dimension_semantics=("parallel",)),
    )(x, ma, sel,
      params["fc1_w"], params["fc1_b"].reshape(1, d_ff),
      params["fc2_w"], params["fc2_b"].reshape(1, d_model),
      params["ln1_g"].reshape(1, d_model), params["ln1_b"].reshape(1, d_model),
      params["ln2_g"].reshape(1, d_model), params["ln2_b"].reshape(1, d_model),
      params["ln3_g"].reshape(1, d_model), params["ln3_b"].reshape(1, d_model))


# --------------------------------------------------------------------------------------
# Pure-JAX replica of the PyTorch module (FFT + top_k + gather) used only for checking.
# --------------------------------------------------------------------------------------

def _reference_series_decomp(x, kernel_size):
    pad = (kernel_size - 1) // 2
    xp = jnp.pad(x, ((0, 0), (pad, pad), (0, 0)), mode="reflect")
    l = x.shape[1]
    mean = jnp.stack([jnp.mean(xp[:, t:t + kernel_size, :], axis=1) for t in range(l)], axis=1)
    return x - mean, mean


def _reference_autocorrelation(q, k, v, n_heads, factor=1):
    b, l, e = q.shape
    hd = e // n_heads
    qh = q.reshape(b, l, n_heads, hd).transpose(0, 2, 1, 3)
    kh = k.reshape(b, l, n_heads, hd).transpose(0, 2, 1, 3)
    vh = v.reshape(b, l, n_heads, hd).transpose(0, 2, 1, 3)
    corr = jnp.fft.irfft(jnp.fft.rfft(qh, axis=2) * jnp.conj(jnp.fft.rfft(kh, axis=2)),
                         n=l, axis=2)
    top_k = max(1, int(factor * math.log(l)))
    w, delay = jax.lax.top_k(corr, top_k)                 # over the last (channel) axis
    w = jax.nn.softmax(w, axis=-1)
    pos = jnp.arange(l, dtype=jnp.int32).reshape(1, 1, l, 1)
    idx = jnp.mod(pos - delay, l)
    bh = b * n_heads
    vv = vh.reshape(bh, l, hd)
    idx = idx.reshape(bh, l, top_k)
    w = w.reshape(bh, l, top_k)
    gathered = jax.vmap(lambda a, i: a[i])(vv, idx)       # [bh, l, top_k, hd]
    out = jnp.sum(gathered * w[..., None], axis=2)
    return out.reshape(b, n_heads, l, hd).transpose(0, 2, 1, 3).reshape(b, l, e)


def reference_encoder_layer(x, params, *, n_heads=N_HEADS, moving_avg=MOVING_AVG,
                            activation=ACTIVATION, eps=LN_EPS):
    hp = jax.lax.Precision.HIGHEST
    seasonal, trend = _reference_series_decomp(x, moving_avg)
    new_x = _reference_autocorrelation(seasonal, seasonal, seasonal, n_heads)
    x1 = _layer_norm(seasonal + new_x, params["ln1_g"], params["ln1_b"], eps)
    y = jnp.dot(x1, params["fc1_w"], precision=hp) + params["fc1_b"]
    y = jax.nn.gelu(y, approximate=False) if activation == "gelu" else jnp.maximum(y, 0.0)
    y = jnp.dot(y, params["fc2_w"], precision=hp) + params["fc2_b"]
    x2 = _layer_norm(x1 + y, params["ln2_g"], params["ln2_b"], eps)
    residual = trend + x2
    x3, _ = _reference_series_decomp(residual, moving_avg)
    return _layer_norm(x3, params["ln3_g"], params["ln3_b"], eps)


def init_params(key, d_model=D_MODEL, d_ff=D_FF):
    ks = jax.random.split(key, 10)
    s = 0.05
    f = jnp.float32
    return {
        "fc1_w": s * jax.random.normal(ks[0], (d_model, d_ff), f),
        "fc1_b": s * jax.random.normal(ks[1], (d_ff,), f),
        "fc2_w": s * jax.random.normal(ks[2], (d_ff, d_model), f),
        "fc2_b": s * jax.random.normal(ks[3], (d_model,), f),
        "ln1_g": 1.0 + s * jax.random.normal(ks[4], (d_model,), f),
        "ln1_b": s * jax.random.normal(ks[5], (d_model,), f),
        "ln2_g": 1.0 + s * jax.random.normal(ks[6], (d_model,), f),
        "ln2_b": s * jax.random.normal(ks[7], (d_model,), f),
        "ln3_g": 1.0 + s * jax.random.normal(ks[8], (d_model,), f),
        "ln3_b": s * jax.random.normal(ks[9], (d_model,), f),
    }


if __name__ == "__main__":
    key = jax.random.PRNGKey(0)
    pkey, xkey = jax.random.split(key)
    params = init_params(pkey)
    x = jax.random.normal(xkey, (BATCH, SEQ_LEN, D_MODEL), jnp.float32)

    fwd = jax.jit(autoformer_encoder_layer)
    out = jax.block_until_ready(fwd(x, params))

    assert out.shape == (BATCH, SEQ_LEN, D_MODEL), out.shape
    assert bool(jnp.all(jnp.isfinite(out)))

    # numeric check against the pure-JAX/XLA replica of the PyTorch layer
    ref = reference_encoder_layer(x, params)
    err = float(jnp.max(jnp.abs(out - ref)))
    assert err < 5e-3, f"max |pallas - reference| = {err}"
    print("KERNEL_OK")
</pallas_src>

<mosaic_0001>
module attributes {stable_mosaic.version = 11 : i64} {
  func.func @_encoder_layer_kernel(%arg0: i32, %arg1: memref<1x16x32xf32, #tpu.memory_space<vmem>>, %arg2: memref<16x16xf32, #tpu.memory_space<vmem>>, %arg3: memref<4x32x32xf32, #tpu.memory_space<vmem>>, %arg4: memref<32x128xf32, #tpu.memory_space<vmem>>, %arg5: memref<1x128xf32, #tpu.memory_space<vmem>>, %arg6: memref<128x32xf32, #tpu.memory_space<vmem>>, %arg7: memref<1x32xf32, #tpu.memory_space<vmem>>, %arg8: memref<1x32xf32, #tpu.memory_space<vmem>>, %arg9: memref<1x32xf32, #tpu.memory_space<vmem>>, %arg10: memref<1x32xf32, #tpu.memory_space<vmem>>, %arg11: memref<1x32xf32, #tpu.memory_space<vmem>>, %arg12: memref<1x32xf32, #tpu.memory_space<vmem>>, %arg13: memref<1x32xf32, #tpu.memory_space<vmem>>, %arg14: memref<1x16x32xf32, #tpu.memory_space<vmem>>) attributes {dimension_semantics = [#tpu.dimension_semantics<parallel>], iteration_bounds = array<i64: 2>, scalar_prefetch = 0 : i64, scratch_operands = 0 : i64, tpu.core_type = #tpu.core_type<tc>, window_params = [{transform_indices = @transform_0, window_bounds = array<i64: 1, 16, 32>}, {pipeline_mode = #tpu.pipeline_mode<synchronous>, transform_indices = @transform_1, window_bounds = array<i64: 16, 16>}, {pipeline_mode = #tpu.pipeline_mode<synchronous>, transform_indices = @transform_2, window_bounds = array<i64: 4, 32, 32>}, {pipeline_mode = #tpu.pipeline_mode<synchronous>, transform_indices = @transform_3, window_bounds = array<i64: 32, 128>}, {pipeline_mode = #tpu.pipeline_mode<synchronous>, transform_indices = @transform_4, window_bounds = array<i64: 1, 128>}, {pipeline_mode = #tpu.pipeline_mode<synchronous>, transform_indices = @transform_5, window_bounds = array<i64: 128, 32>}, {pipeline_mode = #tpu.pipeline_mode<synchronous>, transform_indices = @transform_6, window_bounds = array<i64: 1, 32>}, {pipeline_mode = #tpu.pipeline_mode<synchronous>, transform_indices = @transform_7, window_bounds = array<i64: 1, 32>}, {pipeline_mode = #tpu.pipeline_mode<synchronous>, transform_indices = @transform_8, window_bounds = array<i64: 1, 32>}, {pipeline_mode = #tpu.pipeline_mode<synchronous>, transform_indices = @transform_9, window_bounds = array<i64: 1, 32>}, {pipeline_mode = #tpu.pipeline_mode<synchronous>, transform_indices = @transform_10, window_bounds = array<i64: 1, 32>}, {pipeline_mode = #tpu.pipeline_mode<synchronous>, transform_indices = @transform_11, window_bounds = array<i64: 1, 32>}, {pipeline_mode = #tpu.pipeline_mode<synchronous>, transform_indices = @transform_12, window_bounds = array<i64: 1, 32>}, {transform_indices = @transform_13, window_bounds = array<i64: 1, 16, 32>}]} {
    %c0 = arith.constant 0 : index
    %c0_0 = arith.constant 0 : index
    %c0_1 = arith.constant 0 : index
    %0 = vector.load %arg1[%c0, %c0_0, %c0_1] : memref<1x16x32xf32, #tpu.memory_space<vmem>>, vector<1x16x32xf32>
    %1 = vector.shape_cast %0 : vector<1x16x32xf32> to vector<16x32xf32>
    %c0_2 = arith.constant 0 : index
    %c0_3 = arith.constant 0 : index
    %2 = vector.load %arg2[%c0_2, %c0_3] : memref<16x16xf32, #tpu.memory_space<vmem>>, vector<16x16xf32>
    %cst = arith.constant dense<0.000000e+00> : vector<16x32xf32>
    %3 = tpu.matmul %2, %1, %cst {dimension_numbers = #tpu.dot_dimension_numbers<[1], [0], [0], [1], [0, 0, 1, 1], [], []>} : vector<16x16xf32>, vector<16x32xf32>, vector<16x32xf32> -> vector<16x32xf32>
    %4 = arith.subf %1, %3 : vector<16x32xf32>
    %5 = tpu.concatenate %4, %4 in 0 : vector<16x32xf32>, vector<16x32xf32> -> vector<32x32xf32>
    %6 = tpu.iota {dimensions = array<i32: 0>} : vector<16x32xi32>
    %cst_4 = arith.constant 0.000000e+00 : f32
    %7 = vector.broadcast %cst_4 : f32 to vector<16x32xf32>
    %8 = vector.extract_strided_slice %5 {offsets = [16, 0], sizes = [16, 32], strides = [1, 1]} : vector<32x32xf32> to vector<16x32xf32>
    %9 = arith.mulf %4, %8 : vector<16x32xf32>
    %cst_5 = arith.constant dense<0.000000e+00> : vector<32xf32>
    %10 = vector.multi_reduction <add>, %9, %cst_5 [0] : vector<16x32xf32> to vector<32xf32>
    %11 = vector.shape_cast %10 : vector<32xf32> to vector<1x32xf32>
    %c0_i32 = arith.constant 0 : i32
    %12 = vector.broadcast %c0_i32 : i32 to vector<16x32xi32>
    %13 = arith.cmpi eq, %6, %12 : vector<16x32xi32>
    %cst_6 = arith.constant 0.000000e+00 : f32
    %14 = vector.shape_cast %11 : vector<1x32xf32> to vector<1x32xf32>
    %15 = vector.broadcast %14 : vector<1x32xf32> to vector<16x32xf32>
    %16 = vector.broadcast %cst_6 : f32 to vector<16x32xf32>
    %17 = arith.select %13, %15, %16 : vector<16x32xi1>, vector<16x32xf32>
    %18 = arith.addf %7, %17 : vector<16x32xf32>
    %19 = vector.extract_strided_slice %5 {offsets = [15, 0], sizes = [16, 32], strides = [1, 1]} : vector<32x32xf32> to vector<16x32xf32>
    %20 = arith.mulf %4, %19 : vector<16x32xf32>
    %cst_7 = arith.constant dense<0.000000e+00> : vector<32xf32>
    %21 = vector.multi_reduction <add>, %20, %cst_7 [0] : vector<16x32xf32> to vector<32xf32>
    %22 = vector.shape_cast %21 : vector<32xf32> to vector<1x32xf32>
    %c1_i32 = arith.constant 1 : i32
    %23 = vector.broadcast %c1_i32 : i32 to vector<16x32xi32>
    %24 = arith.cmpi eq, %6, %23 : vector<16x32xi32>
    %cst_8 = arith.constant 0.000000e+00 : f32
    %25 = vector.shape_cast %22 : vector<1x32xf32> to vector<1x32xf32>
    %26 = vector.broadcast %25 : vector<1x32xf32> to vector<16x32xf32>
    %27 = vector.broadcast %cst_8 : f32 to vector<16x32xf32>
    %28 = arith.select %24, %26, %27 : vector<16x32xi1>, vector<16x32xf32>
    %29 = arith.addf %18, %28 : vector<16x32xf32>
    %30 = vector.extract_strided_slice %5 {offsets = [14, 0], sizes = [16, 32], strides = [1, 1]} : vector<32x32xf32> to vector<16x32xf32>
    %31 = arith.mulf %4, %30 : vector<16x32xf32>
    %cst_9 = arith.constant dense<0.000000e+00> : vector<32xf32>
    %32 = vector.multi_reduction <add>, %31, %cst_9 [0] : vector<16x32xf32> to vector<32xf32>
    %33 = vector.shape_cast %32 : vector<32xf32> to vector<1x32xf32>
    %c2_i32 = arith.constant 2 : i32
    %34 = vector.broadcast %c2_i32 : i32 to vector<16x32xi32>
    %35 = arith.cmpi eq, %6, %34 : vector<16x32xi32>
    %cst_10 = arith.constant 0.000000e+00 : f32
    %36 = vector.shape_cast %33 : vector<1x32xf32> to vector<1x32xf32>
    %37 = vector.broadcast %36 : vector<1x32xf32> to vector<16x32xf32>
    %38 = vector.broadcast %cst_10 : f32 to vector<16x32xf32>
    %39 = arith.select %35, %37, %38 : vector<16x32xi1>, vector<16x32xf32>
    %40 = arith.addf %29, %39 : vector<16x32xf32>
    %41 = vector.extract_strided_slice %5 {offsets = [13, 0], sizes = [16, 32], strides = [1, 1]} : vector<32x32xf32> to vector<16x32xf32>
    %42 = arith.mulf %4, %41 : vector<16x32xf32>
    %cst_11 = arith.constant dense<0.000000e+00> : vector<32xf32>
    %43 = vector.multi_reduction <add>, %42, %cst_11 [0] : vector<16x32xf32> to vector<32xf32>
    %44 = vector.shape_cast %43 : vector<32xf32> to vector<1x32xf32>
    %c3_i32 = arith.constant 3 : i32
    %45 = vector.broadcast %c3_i32 : i32 to vector<16x32xi32>
    %46 = arith.cmpi eq, %6, %45 : vector<16x32xi32>
    %cst_12 = arith.constant 0.000000e+00 : f32
    %47 = vector.shape_cast %44 : vector<1x32xf32> to vector<1x32xf32>
    %48 = vector.broadcast %47 : vector<1x32xf32> to vector<16x32xf32>
    %49 = vector.broadcast %cst_12 : f32 to vector<16x32xf32>
    %50 = arith.select %46, %48, %49 : vector<16x32xi1>, vector<16x32xf32>
    %51 = arith.addf %40, %50 : vector<16x32xf32>
    %52 = vector.extract_strided_slice %5 {offsets = [12, 0], sizes = [16, 32], strides = [1, 1]} : vector<32x32xf32> to vector<16x32xf32>
    %53 = arith.mulf %4, %52 : vector<16x32xf32>
    %cst_13 = arith.constant dense<0.000000e+00> : vector<32xf32>
    %54 = vector.multi_reduction <add>, %53, %cst_13 [0] : vector<16x32xf32> to vector<32xf32>
    %55 = vector.shape_cast %54 : vector<32xf32> to vector<1x32xf32>
    %c4_i32 = arith.constant 4 : i32
    %56 = vector.broadcast %c4_i32 : i32 to vector<16x32xi32>
    %57 = arith.cmpi eq, %6, %56 : vector<16x32xi32>
    %cst_14 = arith.constant 0.000000e+00 : f32
    %58 = vector.shape_cast %55 : vector<1x32xf32> to vector<1x32xf32>
    %59 = vector.broadcast %58 : vector<1x32xf32> to vector<16x32xf32>
    %60 = vector.broadcast %cst_14 : f32 to vector<16x32xf32>
    %61 = arith.select %57, %59, %60 : vector<16x32xi1>, vector<16x32xf32>
    %62 = arith.addf %51, %61 : vector<16x32xf32>
    %63 = vector.extract_strided_slice %5 {offsets = [11, 0], sizes = [16, 32], strides = [1, 1]} : vector<32x32xf32> to vector<16x32xf32>
    %64 = arith.mulf %4, %63 : vector<16x32xf32>
    %cst_15 = arith.constant dense<0.000000e+00> : vector<32xf32>
    %65 = vector.multi_reduction <add>, %64, %cst_15 [0] : vector<16x32xf32> to vector<32xf32>
    %66 = vector.shape_cast %65 : vector<32xf32> to vector<1x32xf32>
    %c5_i32 = arith.constant 5 : i32
    %67 = vector.broadcast %c5_i32 : i32 to vector<16x32xi32>
    %68 = arith.cmpi eq, %6, %67 : vector<16x32xi32>
    %cst_16 = arith.constant 0.000000e+00 : f32
    %69 = vector.shape_cast %66 : vector<1x32xf32> to vector<1x32xf32>
    %70 = vector.broadcast %69 : vector<1x32xf32> to vector<16x32xf32>
    %71 = vector.broadcast %cst_16 : f32 to vector<16x32xf32>
    %72 = arith.select %68, %70, %71 : vector<16x32xi1>, vector<16x32xf32>
    %73 = arith.addf %62, %72 : vector<16x32xf32>
    %74 = vector.extract_strided_slice %5 {offsets = [10, 0], sizes = [16, 32], strides = [1, 1]} : vector<32x32xf32> to vector<16x32xf32>
    %75 = arith.mulf %4, %74 : vector<16x32xf32>
    %cst_17 = arith.constant dense<0.000000e+00> : vector<32xf32>
    %76 = vector.multi_reduction <add>, %75, %cst_17 [0] : vector<16x32xf32> to vector<32xf32>
    %77 = vector.shape_cast %76 : vector<32xf32> to vector<1x32xf32>
    %c6_i32 = arith.constant 6 : i32
    %78 = vector.broadcast %c6_i32 : i32 to vector<16x32xi32>
    %79 = arith.cmpi eq, %6, %78 : vector<16x32xi32>
    %cst_18 = arith.constant 0.000000e+00 : f32
    %80 = vector.shape_cast %77 : vector<1x32xf32> to vector<1x32xf32>
    %81 = vector.broadcast %80 : vector<1x32xf32> to vector<16x32xf32>
    %82 = vector.broadcast %cst_18 : f32 to vector<16x32xf32>
    %83 = arith.select %79, %81, %82 : vector<16x32xi1>, vector<16x32xf32>
    %84 = arith.addf %73, %83 : vector<16x32xf32>
    %85 = vector.extract_strided_slice %5 {offsets = [9, 0], sizes = [16, 32], strides = [1, 1]} : vector<32x32xf32> to vector<16x32xf32>
    %86 = arith.mulf %4, %85 : vector<16x32xf32>
    %cst_19 = arith.constant dense<0.000000e+00> : vector<32xf32>
    %87 = vector.multi_reduction <add>, %86, %cst_19 [0] : vector<16x32xf32> to vector<32xf32>
    %88 = vector.shape_cast %87 : vector<32xf32> to vector<1x32xf32>
    %c7_i32 = arith.constant 7 : i32
    %89 = vector.broadcast %c7_i32 : i32 to vector<16x32xi32>
    %90 = arith.cmpi eq, %6, %89 : vector<16x32xi32>
    %cst_20 = arith.constant 0.000000e+00 : f32
    %91 = vector.shape_cast %88 : vector<1x32xf32> to vector<1x32xf32>
    %92 = vector.broadcast %91 : vector<1x32xf32> to vector<16x32xf32>
    %93 = vector.broadcast %cst_20 : f32 to vector<16x32xf32>
    %94 = arith.select %90, %92, %93 : vector<16x32xi1>, vector<16x32xf32>
    %95 = arith.addf %84, %94 : vector<16x32xf32>
    %96 = vector.extract_strided_slice %5 {offsets = [8, 0], sizes = [16, 32], strides = [1, 1]} : vector<32x32xf32> to vector<16x32xf32>
    %97 = arith.mulf %4, %96 : vector<16x32xf32>
    %cst_21 = arith.constant dense<0.000000e+00> : vector<32xf32>
    %98 = vector.multi_reduction <add>, %97, %cst_21 [0] : vector<16x32xf32> to vector<32xf32>
    %99 = vector.shape_cast %98 : vector<32xf32> to vector<1x32xf32>
    %c8_i32 = arith.constant 8 : i32
    %100 = vector.broadcast %c8_i32 : i32 to vector<16x32xi32>
    %101 = arith.cmpi eq, %6, %100 : vector<16x32xi32>
    %cst_22 = arith.constant 0.000000e+00 : f32
    %102 = vector.shape_cast %99 : vector<1x32xf32> to vector<1x32xf32>
    %103 = vector.broadcast %102 : vector<1x32xf32> to vector<16x32xf32>
    %104 = vector.broadcast %cst_22 : f32 to vector<16x32xf32>
    %105 = arith.select %101, %103, %104 : vector<16x32xi1>, vector<16x32xf32>
    %106 = arith.addf %95, %105 : vector<16x32xf32>
    %107 = vector.extract_strided_slice %5 {offsets = [7, 0], sizes = [16, 32], strides = [1, 1]} : vector<32x32xf32> to vector<16x32xf32>
    %108 = arith.mulf %4, %107 : vector<16x32xf32>
    %cst_23 = arith.constant dense<0.000000e+00> : vector<32xf32>
    %109 = vector.multi_reduction <add>, %108, %cst_23 [0] : vector<16x32xf32> to vector<32xf32>
    %110 = vector.shape_cast %109 : vector<32xf32> to vector<1x32xf32>
    %c9_i32 = arith.constant 9 : i32
    %111 = vector.broadcast %c9_i32 : i32 to vector<16x32xi32>
    %112 = arith.cmpi eq, %6, %111 : vector<16x32xi32>
    %cst_24 = arith.constant 0.000000e+00 : f32
    %113 = vector.shape_cast %110 : vector<1x32xf32> to vector<1x32xf32>
    %114 = vector.broadcast %113 : vector<1x32xf32> to vector<16x32xf32>
    %115 = vector.broadcast %cst_24 : f32 to vector<16x32xf32>
    %116 = arith.select %112, %114, %115 : vector<16x32xi1>, vector<16x32xf32>
    %117 = arith.addf %106, %116 : vector<16x32xf32>
    %118 = vector.extract_strided_slice %5 {offsets = [6, 0], sizes = [16, 32], strides = [1, 1]} : vector<32x32xf32> to vector<16x32xf32>
    %119 = arith.mulf %4, %118 : vector<16x32xf32>
    %cst_25 = arith.constant dense<0.000000e+00> : vector<32xf32>
    %120 = vector.multi_reduction <add>, %119, %cst_25 [0] : vector<16x32xf32> to vector<32xf32>
    %121 = vector.shape_cast %120 : vector<32xf32> to vector<1x32xf32>
    %c10_i32 = arith.constant 10 : i32
    %122 = vector.broadcast %c10_i32 : i32 to vector<16x32xi32>
    %123 = arith.cmpi eq, %6, %122 : vector<16x32xi32>
    %cst_26 = arith.constant 0.000000e+00 : f32
    %124 = vector.shape_cast %121 : vector<1x32xf32> to vector<1x32xf32>
    %125 = vector.broadcast %124 : vector<1x32xf32> to vector<16x32xf32>
    %126 = vector.broadcast %cst_26 : f32 to vector<16x32xf32>
    %127 = arith.select %123, %125, %126 : vector<16x32xi1>, vector<16x32xf32>
    %128 = arith.addf %117, %127 : vector<16x32xf32>
    %129 = vector.extract_strided_slice %5 {offsets = [5, 0], sizes = [16, 32], strides = [1, 1]} : vector<32x32xf32> to vector<16x32xf32>
    %130 = arith.mulf %4, %129 : vector<16x32xf32>
    %cst_27 = arith.constant dense<0.000000e+00> : vector<32xf32>
    %131 = vector.multi_reduction <add>, %130, %cst_27 [0] : vector<16x32xf32> to vector<32xf32>
    %132 = vector.shape_cast %131 : vector<32xf32> to vector<1x32xf32>
    %c11_i32 = arith.constant 11 : i32
    %133 = vector.broadcast %c11_i32 : i32 to vector<16x32xi32>
    %134 = arith.cmpi eq, %6, %133 : vector<16x32xi32>
    %cst_28 = arith.constant 0.000000e+00 : f32
    %135 = vector.shape_cast %132 : vector<1x32xf32> to vector<1x32xf32>
    %136 = vector.broadcast %135 : vector<1x32xf32> to vector<16x32xf32>
    %137 = vector.broadcast %cst_28 : f32 to vector<16x32xf32>
    %138 = arith.select %134, %136, %137 : vector<16x32xi1>, vector<16x32xf32>
    %139 = arith.addf %128, %138 : vector<16x32xf32>
    %140 = vector.extract_strided_slice %5 {offsets = [4, 0], sizes = [16, 32], strides = [1, 1]} : vector<32x32xf32> to vector<16x32xf32>
    %141 = arith.mulf %4, %140 : vector<16x32xf32>
    %cst_29 = arith.constant dense<0.000000e+00> : vector<32xf32>
    %142 = vector.multi_reduction <add>, %141, %cst_29 [0] : vector<16x32xf32> to vector<32xf32>
    %143 = vector.shape_cast %142 : vector<32xf32> to vector<1x32xf32>
    %c12_i32 = arith.constant 12 : i32
    %144 = vector.broadcast %c12_i32 : i32 to vector<16x32xi32>
    %145 = arith.cmpi eq, %6, %144 : vector<16x32xi32>
    %cst_30 = arith.constant 0.000000e+00 : f32
    %146 = vector.shape_cast %143 : vector<1x32xf32> to vector<1x32xf32>
    %147 = vector.broadcast %146 : vector<1x32xf32> to vector<16x32xf32>
    %148 = vector.broadcast %cst_30 : f32 to vector<16x32xf32>
    %149 = arith.select %145, %147, %148 : vector<16x32xi1>, vector<16x32xf32>
    %150 = arith.addf %139, %149 : vector<16x32xf32>
    %151 = vector.extract_strided_slice %5 {offsets = [3, 0], sizes = [16, 32], strides = [1, 1]} : vector<32x32xf32> to vector<16x32xf32>
    %152 = arith.mulf %4, %151 : vector<16x32xf32>
    %cst_31 = arith.constant dense<0.000000e+00> : vector<32xf32>
    %153 = vector.multi_reduction <add>, %152, %cst_31 [0] : vector<16x32xf32> to vector<32xf32>
    %154 = vector.shape_cast %153 : vector<32xf32> to vector<1x32xf32>
    %c13_i32 = arith.constant 13 : i32
    %155 = vector.broadcast %c13_i32 : i32 to vector<16x32xi32>
    %156 = arith.cmpi eq, %6, %155 : vector<16x32xi32>
    %cst_32 = arith.constant 0.000000e+00 : f32
    %157 = vector.shape_cast %154 : vector<1x32xf32> to vector<1x32xf32>
    %158 = vector.broadcast %157 : vector<1x32xf32> to vector<16x32xf32>
    %159 = vector.broadcast %cst_32 : f32 to vector<16x32xf32>
    %160 = arith.select %156, %158, %159 : vector<16x32xi1>, vector<16x32xf32>
    %161 = arith.addf %150, %160 : vector<16x32xf32>
    %162 = vector.extract_strided_slice %5 {offsets = [2, 0], sizes = [16, 32], strides = [1, 1]} : vector<32x32xf32> to vector<16x32xf32>
    %163 = arith.mulf %4, %162 : vector<16x32xf32>
    %cst_33 = arith.constant dense<0.000000e+00> : vector<32xf32>
    %164 = vector.multi_reduction <add>, %163, %cst_33 [0] : vector<16x32xf32> to vector<32xf32>
    %165 = vector.shape_cast %164 : vector<32xf32> to vector<1x32xf32>
    %c14_i32 = arith.constant 14 : i32
    %166 = vector.broadcast %c14_i32 : i32 to vector<16x32xi32>
    %167 = arith.cmpi eq, %6, %166 : vector<16x32xi32>
    %cst_34 = arith.constant 0.000000e+00 : f32
    %168 = vector.shape_cast %165 : vector<1x32xf32> to vector<1x32xf32>
    %169 = vector.broadcast %168 : vector<1x32xf32> to vector<16x32xf32>
    %170 = vector.broadcast %cst_34 : f32 to vector<16x32xf32>
    %171 = arith.select %167, %169, %170 : vector<16x32xi1>, vector<16x32xf32>
    %172 = arith.addf %161, %171 : vector<16x32xf32>
    %173 = vector.extract_strided_slice %5 {offsets = [1, 0], sizes = [16, 32], strides = [1, 1]} : vector<32x32xf32> to vector<16x32xf32>
    %174 = arith.mulf %4, %173 : vector<16x32xf32>
    %cst_35 = arith.constant dense<0.000000e+00> : vector<32xf32>
    %175 = vector.multi_reduction <add>, %174, %cst_35 [0] : vector<16x32xf32> to vector<32xf32>
    %176 = vector.shape_cast %175 : vector<32xf32> to vector<1x32xf32>
    %c15_i32 = arith.constant 15 : i32
    %177 = vector.broadcast %c15_i32 : i32 to vector<16x32xi32>
    %178 = arith.cmpi eq, %6, %177 : vector<16x32xi32>
    %cst_36 = arith.constant 0.000000e+00 : f32
    %179 = vector.shape_cast %176 : vector<1x32xf32> to vector<1x32xf32>
    %180 = vector.broadcast %179 : vector<1x32xf32> to vector<16x32xf32>
    %181 = vector.broadcast %cst_36 : f32 to vector<16x32xf32>
    %182 = arith.select %178, %180, %181 : vector<16x32xi1>, vector<16x32xf32>
    %183 = arith.addf %172, %182 : vector<16x32xf32>
    %c0_37 = arith.constant 0 : index
    %c0_38 = arith.constant 0 : index
    %c0_39 = arith.constant 0 : index
    %184 = vector.load %arg3[%c0_37, %c0_38, %c0_39] : memref<4x32x32xf32, #tpu.memory_space<vmem>>, vector<1x32x32xf32>
    %185 = vector.shape_cast %184 : vector<1x32x32xf32> to vector<32x32xf32>
    %cst_40 = arith.constant dense<0.000000e+00> : vector<16x32xf32>
    %186 = tpu.matmul %183, %185, %cst_40 {dimension_numbers = #tpu.dot_dimension_numbers<[1], [0], [0], [1], [0, 0, 1, 1], [], []>} : vector<16x32xf32>, vector<32x32xf32>, vector<16x32xf32> -> vector<16x32xf32>
    %c1 = arith.constant 1 : index
    %c0_41 = arith.constant 0 : index
    %c0_42 = arith.constant 0 : index
    %187 = vector.load %arg3[%c1, %c0_41, %c0_42] : memref<4x32x32xf32, #tpu.memory_space<vmem>>, vector<1x32x32xf32>
    %188 = vector.shape_cast %187 : vector<1x32x32xf32> to vector<32x32xf32>
    %cst_43 = arith.constant dense<0.000000e+00> : vector<16x32xf32>
    %189 = tpu.matmul %183, %188, %cst_43 {dimension_numbers = #tpu.dot_dimension_numbers<[1], [0], [0], [1], [0, 0, 1, 1], [], []>} : vector<16x32xf32>, vector<32x32xf32>, vector<16x32xf32> -> vector<16x32xf32>
    %c2 = arith.constant 2 : index
    %c0_44 = arith.constant 0 : index
    %c0_45 = arith.constant 0 : index
    %190 = vector.load %arg3[%c2, %c0_44, %c0_45] : memref<4x32x32xf32, #tpu.memory_space<vmem>>, vector<1x32x32xf32>
    %191 = vector.shape_cast %190 : vector<1x32x32xf32> to vector<32x32xf32>
    %cst_46 = arith.constant dense<0.000000e+00> : vector<16x32xf32>
    %192 = tpu.matmul %183, %191, %cst_46 {dimension_numbers = #tpu.dot_dimension_numbers<[1], [0], [0], [1], [0, 0, 1, 1], [], []>} : vector<16x32xf32>, vector<32x32xf32>, vector<16x32xf32> -> vector<16x32xf32>
    %c3 = arith.constant 3 : index
    %c0_47 = arith.constant 0 : index
    %c0_48 = arith.constant 0 : index
    %193 = vector.load %arg3[%c3, %c0_47, %c0_48] : memref<4x32x32xf32, #tpu.memory_space<vmem>>, vector<1x32x32xf32>
    %194 = vector.shape_cast %193 : vector<1x32x32xf32> to vector<32x32xf32>
    %cst_49 = arith.constant dense<0.000000e+00> : vector<16x32xf32>
    %195 = tpu.matmul %183, %194, %cst_49 {dimension_numbers = #tpu.dot_dimension_numbers<[1], [0], [0], [1], [0, 0, 1, 1], [], []>} : vector<16x32xf32>, vector<32x32xf32>, vector<16x32xf32> -> vector<16x32xf32>
    %196 = arith.maximumf %186, %189 : vector<16x32xf32>
    %197 = arith.maximumf %196, %192 : vector<16x32xf32>
    %198 = arith.maximumf %197, %195 : vector<16x32xf32>
    %199 = arith.cmpf oeq, %186, %198 : vector<16x32xf32>
    %200 = arith.cmpf oeq, %189, %198 : vector<16x32xf32>
    %201 = arith.cmpf oeq, %192, %198 : vector<16x32xf32>
    %202 = arith.cmpf oeq, %195, %198 : vector<16x32xf32>
    %cst_50 = arith.constant -1.000000e+30 : f32
    %203 = vector.broadcast %cst_50 : f32 to vector<16x32xf32>
    %204 = arith.select %199, %203, %186 : vector<16x32xi1>, vector<16x32xf32>
    %cst_51 = arith.constant -1.000000e+30 : f32
    %205 = vector.broadcast %cst_51 : f32 to vector<16x32xf32>
    %206 = arith.select %200, %205, %189 : vector<16x32xi1>, vector<16x32xf32>
    %cst_52 = arith.constant -1.000000e+30 : f32
    %207 = vector.broadcast %cst_52 : f32 to vector<16x32xf32>
    %208 = arith.select %201, %207, %192 : vector<16x32xi1>, vector<16x32xf32>
    %cst_53 = arith.constant -1.000000e+30 : f32
    %209 = vector.broadcast %cst_53 : f32 to vector<16x32xf32>
    %210 = arith.select %202, %209, %195 : vector<16x32xi1>, vector<16x32xf32>
    %211 = arith.maximumf %204, %206 : vector<16x32xf32>
    %212 = arith.maximumf %211, %208 : vector<16x32xf32>
    %213 = arith.maximumf %212, %210 : vector<16x32xf32>
    %214 = arith.cmpf oeq, %204, %213 : vector<16x32xf32>
    %215 = arith.cmpf oeq, %206, %213 : vector<16x32xf32>
    %216 = arith.cmpf oeq, %208, %213 : vector<16x32xf32>
    %217 = arith.cmpf oeq, %210, %213 : vector<16x32xf32>
    %218 = arith.subf %198, %198 : vector<16x32xf32>
    %219 = math.exp %218 : vector<16x32xf32>
    %220 = arith.subf %213, %198 : vector<16x32xf32>
    %221 = math.exp %220 : vector<16x32xf32>
    %222 = arith.addf %219, %221 : vector<16x32xf32>
    %223 = arith.divf %219, %222 : vector<16x32xf32>
    %224 = arith.divf %221, %222 : vector<16x32xf32>
    %cst_54 = arith.constant 0.000000e+00 : f32
    %225 = vector.broadcast %cst_54 : f32 to vector<16x32xf32>
    %cst_55 = arith.constant 0.000000e+00 : f32
    %226 = vector.broadcast %cst_55 : f32 to vector<16x32xf32>
    %cst_56 = arith.constant 0.000000e+00 : f32
    %227 = vector.broadcast %cst_56 : f32 to vector<16x32xf32>
    %228 = arith.select %199, %223, %227 : vector<16x32xi1>, vector<16x32xf32>
    %229 = arith.addf %226, %228 : vector<16x32xf32>
    %cst_57 = arith.constant 0.000000e+00 : f32
    %230 = vector.broadcast %cst_57 : f32 to vector<16x32xf32>
    %231 = arith.select %214, %224, %230 : vector<16x32xi1>, vector<16x32xf32>
    %232 = arith.addf %229, %231 : vector<16x32xf32>
    %233 = vector.extract_strided_slice %5 {offsets = [16, 0], sizes = [16, 32], strides = [1, 1]} : vector<32x32xf32> to vector<16x32xf32>
    %234 = arith.mulf %232, %233 : vector<16x32xf32>
    %235 = arith.addf %225, %234 : vector<16x32xf32>
    %cst_58 = arith.constant 0.000000e+00 : f32
    %236 = vector.broadcast %cst_58 : f32 to vector<16x32xf32>
    %cst_59 = arith.constant 0.000000e+00 : f32
    %237 = vector.broadcast %cst_59 : f32 to vector<16x32xf32>
    %238 = arith.select %200, %223, %237 : vector<16x32xi1>, vector<16x32xf32>
    %239 = arith.addf %236, %238 : vector<16x32xf32>
    %cst_60 = arith.constant 0.000000e+00 : f32
    %240 = vector.broadcast %cst_60 : f32 to vector<16x32xf32>
    %241 = arith.select %215, %224, %240 : vector<16x32xi1>, vector<16x32xf32>
    %242 = arith.addf %239, %241 : vector<16x32xf32>
    %243 = vector.extract_strided_slice %5 {offsets = [15, 0], sizes = [16, 32], strides = [1, 1]} : vector<32x32xf32> to vector<16x32xf32>
    %244 = arith.mulf %242, %243 : vector<16x32xf32>
    %245 = arith.addf %235, %244 : vector<16x32xf32>
    %cst_61 = arith.constant 0.000000e+00 : f32
    %246 = vector.broadcast %cst_61 : f32 to vector<16x32xf32>
    %cst_62 = arith.constant 0.000000e+00 : f32
    %247 = vector.broadcast %cst_62 : f32 to vector<16x32xf32>
    %248 = arith.select %201, %223, %247 : vector<16x32xi1>, vector<16x32xf32>
    %249 = arith.addf %246, %248 : vector<16x32xf32>
    %cst_63 = arith.constant 0.000000e+00 : f32
    %250 = vector.broadcast %cst_63 : f32 to vector<16x32xf32>
    %251 = arith.select %216, %224, %250 : vector<16x32xi1>, vector<16x32xf32>
    %252 = arith.addf %249, %251 : vector<16x32xf32>
    %253 = vector.extract_strided_slice %5 {offsets = [14, 0], sizes = [16, 32], strides = [1, 1]} : vector<32x32xf32> to vector<16x32xf32>
    %254 = arith.mulf %252, %253 : vector<16x32xf32>
    %255 = arith.addf %245, %254 : vector<16x32xf32>
    %cst_64 = arith.constant 0.000000e+00 : f32
    %256 = vector.broadcast %cst_64 : f32 to vector<16x32xf32>
    %cst_65 = arith.constant 0.000000e+00 : f32
    %257 = vector.broadcast %cst_65 : f32 to vector<16x32xf32>
    %258 = arith.select %202, %223, %257 : vector<16x32xi1>, vector<16x32xf32>
    %259 = arith.addf %256, %258 : vector<16x32xf32>
    %cst_66 = arith.constant 0.000000e+00 : f32
    %260 = vector.broadcast %cst_66 : f32 to vector<16x32xf32>
    %261 = arith.select %217, %224, %260 : vector<16x32xi1>, vector<16x32xf32>
    %262 = arith.addf %259, %261 : vector<16x32xf32>
    %263 = vector.extract_strided_slice %5 {offsets = [13, 0], sizes = [16, 32], strides = [1, 1]} : vector<32x32xf32> to vector<16x32xf32>
    %264 = arith.mulf %262, %263 : vector<16x32xf32>
    %265 = arith.addf %255, %264 : vector<16x32xf32>
    %266 = arith.addf %4, %265 : vector<16x32xf32>
    %c0_67 = arith.constant 0 : index
    %c0_68 = arith.constant 0 : index
    %267 = vector.load %arg8[%c0_67, %c0_68] : memref<1x32xf32, #tpu.memory_space<vmem>>, vector<1x32xf32>
    %c0_69 = arith.constant 0 : index
    %c0_70 = arith.constant 0 : index
    %268 = vector.load %arg9[%c0_69, %c0_70] : memref<1x32xf32, #tpu.memory_space<vmem>>, vector<1x32xf32>
    %cst_71 = arith.constant dense<0.000000e+00> : vector<16xf32>
    %269 = vector.multi_reduction <add>, %266, %cst_71 [1] : vector<16x32xf32> to vector<16xf32>
    %270 = vector.shape_cast %269 : vector<16xf32> to vector<16x1xf32>
    %cst_72 = arith.constant 3.200000e+01 : f32
    %271 = vector.broadcast %cst_72 : f32 to vector<16x1xf32>
    %272 = arith.divf %270, %271 : vector<16x1xf32>
    %273 = vector.broadcast %272 : vector<16x1xf32> to vector<16x32xf32>
    %274 = arith.subf %266, %273 : vector<16x32xf32>
    %275 = arith.mulf %274, %274 : vector<16x32xf32>
    %cst_73 = arith.constant dense<0.000000e+00> : vector<16xf32>
    %276 = vector.multi_reduction <add>, %275, %cst_73 [1] : vector<16x32xf32> to vector<16xf32>
    %277 = vector.shape_cast %276 : vector<16xf32> to vector<16x1xf32>
    %cst_74 = arith.constant 3.200000e+01 : f32
    %278 = vector.broadcast %cst_74 : f32 to vector<16x1xf32>
    %279 = arith.divf %277, %278 : vector<16x1xf32>
    %280 = vector.broadcast %272 : vector<16x1xf32> to vector<16x32xf32>
    %281 = arith.subf %266, %280 : vector<16x32xf32>
    %cst_75 = arith.constant 9.99999974E-6 : f32
    %282 = vector.broadcast %cst_75 : f32 to vector<16x1xf32>
    %283 = arith.addf %279, %282 : vector<16x1xf32>
    %284 = math.rsqrt %283 : vector<16x1xf32>
    %285 = vector.broadcast %284 : vector<16x1xf32> to vector<16x32xf32>
    %286 = arith.mulf %281, %285 : vector<16x32xf32>
    %287 = vector.broadcast %267 : vector<1x32xf32> to vector<16x32xf32>
    %288 = arith.mulf %286, %287 : vector<16x32xf32>
    %289 = vector.broadcast %268 : vector<1x32xf32> to vector<16x32xf32>
    %290 = arith.addf %288, %289 : vector<16x32xf32>
    %c0_76 = arith.constant 0 : index
    %c0_77 = arith.constant 0 : index
    %291 = vector.load %arg4[%c0_76, %c0_77] : memref<32x128xf32, #tpu.memory_space<vmem>>, vector<32x128xf32>
    %cst_78 = arith.constant dense<0.000000e+00> : vector<16x128xf32>
    %292 = tpu.matmul %290, %291, %cst_78 {dimension_numbers = #tpu.dot_dimension_numbers<[1], [0], [0], [1], [0, 0, 1, 1], [], []>} : vector<16x32xf32>, vector<32x128xf32>, vector<16x128xf32> -> vector<16x128xf32>
    %c0_79 = arith.constant 0 : index
    %c0_80 = arith.constant 0 : index
    %293 = vector.load %arg5[%c0_79, %c0_80] : memref<1x128xf32, #tpu.memory_space<vmem>>, vector<1x128xf32>
    %294 = vector.broadcast %293 : vector<1x128xf32> to vector<16x128xf32>
    %295 = arith.addf %292, %294 : vector<16x128xf32>
    %cst_81 = arith.constant 0.000000e+00 : f32
    %296 = vector.broadcast %cst_81 : f32 to vector<16x128xf32>
    %297 = arith.maximumf %295, %296 : vector<16x128xf32>
    %c0_82 = arith.constant 0 : index
    %c0_83 = arith.constant 0 : index
    %298 = vector.load %arg6[%c0_82, %c0_83] : memref<128x32xf32, #tpu.memory_space<vmem>>, vector<128x32xf32>
    %cst_84 = arith.constant dense<0.000000e+00> : vector<16x32xf32>
    %299 = tpu.matmul %297, %298, %cst_84 {dimension_numbers = #tpu.dot_dimension_numbers<[1], [0], [0], [1], [0, 0, 1, 1], [], []>} : vector<16x128xf32>, vector<128x32xf32>, vector<16x32xf32> -> vector<16x32xf32>
    %c0_85 = arith.constant 0 : index
    %c0_86 = arith.constant 0 : index
    %300 = vector.load %arg7[%c0_85, %c0_86] : memref<1x32xf32, #tpu.memory_space<vmem>>, vector<1x32xf32>
    %301 = vector.broadcast %300 : vector<1x32xf32> to vector<16x32xf32>
    %302 = arith.addf %299, %301 : vector<16x32xf32>
    %303 = arith.addf %290, %302 : vector<16x32xf32>
    %c0_87 = arith.constant 0 : index
    %c0_88 = arith.constant 0 : index
    %304 = vector.load %arg10[%c0_87, %c0_88] : memref<1x32xf32, #tpu.memory_space<vmem>>, vector<1x32xf32>
    %c0_89 = arith.constant 0 : index
    %c0_90 = arith.constant 0 : index
    %305 = vector.load %arg11[%c0_89, %c0_90] : memref<1x32xf32, #tpu.memory_space<vmem>>, vector<1x32xf32>
    %cst_91 = arith.constant dense<0.000000e+00> : vector<16xf32>
    %306 = vector.multi_reduction <add>, %303, %cst_91 [1] : vector<16x32xf32> to vector<16xf32>
    %307 = vector.shape_cast %306 : vector<16xf32> to vector<16x1xf32>
    %cst_92 = arith.constant 3.200000e+01 : f32
    %308 = vector.broadcast %cst_92 : f32 to vector<16x1xf32>
    %309 = arith.divf %307, %308 : vector<16x1xf32>
    %310 = vector.broadcast %309 : vector<16x1xf32> to vector<16x32xf32>
    %311 = arith.subf %303, %310 : vector<16x32xf32>
    %312 = arith.mulf %311, %311 : vector<16x32xf32>
    %cst_93 = arith.constant dense<0.000000e+00> : vector<16xf32>
    %313 = vector.multi_reduction <add>, %312, %cst_93 [1] : vector<16x32xf32> to vector<16xf32>
    %314 = vector.shape_cast %313 : vector<16xf32> to vector<16x1xf32>
    %cst_94 = arith.constant 3.200000e+01 : f32
    %315 = vector.broadcast %cst_94 : f32 to vector<16x1xf32>
    %316 = arith.divf %314, %315 : vector<16x1xf32>
    %317 = vector.broadcast %309 : vector<16x1xf32> to vector<16x32xf32>
    %318 = arith.subf %303, %317 : vector<16x32xf32>
    %cst_95 = arith.constant 9.99999974E-6 : f32
    %319 = vector.broadcast %cst_95 : f32 to vector<16x1xf32>
    %320 = arith.addf %316, %319 : vector<16x1xf32>
    %321 = math.rsqrt %320 : vector<16x1xf32>
    %322 = vector.broadcast %321 : vector<16x1xf32> to vector<16x32xf32>
    %323 = arith.mulf %318, %322 : vector<16x32xf32>
    %324 = vector.broadcast %304 : vector<1x32xf32> to vector<16x32xf32>
    %325 = arith.mulf %323, %324 : vector<16x32xf32>
    %326 = vector.broadcast %305 : vector<1x32xf32> to vector<16x32xf32>
    %327 = arith.addf %325, %326 : vector<16x32xf32>
    %328 = arith.addf %3, %327 : vector<16x32xf32>
    %cst_96 = arith.constant dense<0.000000e+00> : vector<16x32xf32>
    %329 = tpu.matmul %2, %328, %cst_96 {dimension_numbers = #tpu.dot_dimension_numbers<[1], [0], [0], [1], [0, 0, 1, 1], [], []>} : vector<16x16xf32>, vector<16x32xf32>, vector<16x32xf32> -> vector<16x32xf32>
    %330 = arith.subf %328, %329 : vector<16x32xf32>
    %c0_97 = arith.constant 0 : index
    %c0_98 = arith.constant 0 : index
    %331 = vector.load %arg12[%c0_97, %c0_98] : memref<1x32xf32, #tpu.memory_space<vmem>>, vector<1x32xf32>
    %c0_99 = arith.constant 0 : index
    %c0_100 = arith.constant 0 : index
    %332 = vector.load %arg13[%c0_99, %c0_100] : memref<1x32xf32, #tpu.memory_space<vmem>>, vector<1x32xf32>
    %cst_101 = arith.constant dense<0.000000e+00> : vector<16xf32>
    %333 = vector.multi_reduction <add>, %330, %cst_101 [1] : vector<16x32xf32> to vector<16xf32>
    %334 = vector.shape_cast %333 : vector<16xf32> to vector<16x1xf32>
    %cst_102 = arith.constant 3.200000e+01 : f32
    %335 = vector.broadcast %cst_102 : f32 to vector<16x1xf32>
    %336 = arith.divf %334, %335 : vector<16x1xf32>
    %337 = vector.broadcast %336 : vector<16x1xf32> to vector<16x32xf32>
    %338 = arith.subf %330, %337 : vector<16x32xf32>
    %339 = arith.mulf %338, %338 : vector<16x32xf32>
    %cst_103 = arith.constant dense<0.000000e+00> : vector<16xf32>
    %340 = vector.multi_reduction <add>, %339, %cst_103 [1] : vector<16x32xf32> to vector<16xf32>
    %341 = vector.shape_cast %340 : vector<16xf32> to vector<16x1xf32>
    %cst_104 = arith.constant 3.200000e+01 : f32
    %342 = vector.broadcast %cst_104 : f32 to vector<16x1xf32>
    %343 = arith.divf %341, %342 : vector<16x1xf32>
    %344 = vector.broadcast %336 : vector<16x1xf32> to vector<16x32xf32>
    %345 = arith.subf %330, %344 : vector<16x32xf32>
    %cst_105 = arith.constant 9.99999974E-6 : f32
    %346 = vector.broadcast %cst_105 : f32 to vector<16x1xf32>
    %347 = arith.addf %343, %346 : vector<16x1xf32>
    %348 = math.rsqrt %347 : vector<16x1xf32>
    %349 = vector.broadcast %348 : vector<16x1xf32> to vector<16x32xf32>
    %350 = arith.mulf %345, %349 : vector<16x32xf32>
    %351 = vector.broadcast %331 : vector<1x32xf32> to vector<16x32xf32>
    %352 = arith.mulf %350, %351 : vector<16x32xf32>
    %353 = vector.broadcast %332 : vector<1x32xf32> to vector<16x32xf32>
    %354 = arith.addf %352, %353 : vector<16x32xf32>
    %c0_106 = arith.constant 0 : index
    %c0_107 = arith.constant 0 : index
    %c0_108 = arith.constant 0 : index
    %355 = vector.load %arg14[%c0_106, %c0_107, %c0_108] : memref<1x16x32xf32, #tpu.memory_space<vmem>>, vector<1x16x32xf32>
    %356 = vector.shape_cast %355 : vector<1x16x32xf32> to vector<16x32xf32>
    %357 = vector.shape_cast %354 : vector<16x32xf32> to vector<1x16x32xf32>
    tpu.vector_store %arg14[%c0_106, %c0_107, %c0_108], %357 {strides = array<i32>} : memref<1x16x32xf32, #tpu.memory_space<vmem>>, vector<1x16x32xf32>,
    return
  }
  func.func @transform_0(%arg0: i32) -> (i32, i32, i32) {
    %c0_i32 = arith.constant 0 : i32
    %c0_i32_0 = arith.constant 0 : i32
    %c0_i32_1 = arith.constant 0 : i32
    return %arg0, %c0_i32, %c0_i32_0 : i32, i32, i32
  }
  func.func @transform_1(%arg0: i32) -> (i32, i32) {
    %c0_i32 = arith.constant 0 : i32
    %c0_i32_0 = arith.constant 0 : i32
    %c0_i32_1 = arith.constant 0 : i32
    return %c0_i32, %c0_i32_0 : i32, i32
  }
  func.func @transform_2(%arg0: i32) -> (i32, i32, i32) {
    %c0_i32 = arith.constant 0 : i32
    %c0_i32_0 = arith.constant 0 : i32
    %c0_i32_1 = arith.constant 0 : i32
    %c0_i32_2 = arith.constant 0 : i32
    return %c0_i32, %c0_i32_0, %c0_i32_1 : i32, i32, i32
  }
  func.func @transform_3(%arg0: i32) -> (i32, i32) {
    %c0_i32 = arith.constant 0 : i32
    %c0_i32_0 = arith.constant 0 : i32
    %c0_i32_1 = arith.constant 0 : i32
    return %c0_i32, %c0_i32_0 : i32, i32
  }
  func.func @transform_4(%arg0: i32) -> (i32, i32) {
    %c0_i32 = arith.constant 0 : i32
    %c0_i32_0 = arith.constant 0 : i32
    %c0_i32_1 = arith.constant 0 : i32
    return %c0_i32, %c0_i32_0 : i32, i32
  }
  func.func @transform_5(%arg0: i32) -> (i32, i32) {
    %c0_i32 = arith.constant 0 : i32
    %c0_i32_0 = arith.constant 0 : i32
    %c0_i32_1 = arith.constant 0 : i32
    return %c0_i32, %c0_i32_0 : i32, i32
  }
  func.func @transform_6(%arg0: i32) -> (i32, i32) {
    %c0_i32 = arith.constant 0 : i32
    %c0_i32_0 = arith.constant 0 : i32
    %c0_i32_1 = arith.constant 0 : i32
    return %c0_i32, %c0_i32_0 : i32, i32
  }
  func.func @transform_7(%arg0: i32) -> (i32, i32) {
    %c0_i32 = arith.constant 0 : i32
    %c0_i32_0 = arith.constant 0 : i32
    %c0_i32_1 = arith.constant 0 : i32
    return %c0_i32, %c0_i32_0 : i32, i32
  }
  func.func @transform_8(%arg0: i32) -> (i32, i32) {
    %c0_i32 = arith.constant 0 : i32
    %c0_i32_0 = arith.constant 0 : i32
    %c0_i32_1 = arith.constant 0 : i32
    return %c0_i32, %c0_i32_0 : i32, i32
  }
  func.func @transform_9(%arg0: i32) -> (i32, i32) {
    %c0_i32 = arith.constant 0 : i32
    %c0_i32_0 = arith.constant 0 : i32
    %c0_i32_1 = arith.constant 0 : i32
    return %c0_i32, %c0_i32_0 : i32, i32
  }
  func.func @transform_10(%arg0: i32) -> (i32, i32) {
    %c0_i32 = arith.constant 0 : i32
    %c0_i32_0 = arith.constant 0 : i32
    %c0_i32_1 = arith.constant 0 : i32
    return %c0_i32, %c0_i32_0 : i32, i32
  }
  func.func @transform_11(%arg0: i32) -> (i32, i32) {
    %c0_i32 = arith.constant 0 : i32
    %c0_i32_0 = arith.constant 0 : i32
    %c0_i32_1 = arith.constant 0 : i32
    return %c0_i32, %c0_i32_0 : i32, i32
  }
  func.func @transform_12(%arg0: i32) -> (i32, i32) {
    %c0_i32 = arith.constant 0 : i32
    %c0_i32_0 = arith.constant 0 : i32
    %c0_i32_1 = arith.constant 0 : i32
    return %c0_i32, %c0_i32_0 : i32, i32
  }
  func.func @transform_13(%arg0: i32) -> (i32, i32, i32) {
    %c0_i32 = arith.constant 0 : i32
    %c0_i32_0 = arith.constant 0 : i32
    %c0_i32_1 = arith.constant 0 : i32
    return %arg0, %c0_i32, %c0_i32_0 : i32, i32, i32
  }
}

</mosaic_0001>

<bundles_post_ra>
// kernel: autoformer_encoder_layer.1
= control target key start
LH: loop header
LB: loop body
LE: loop exit
PB: predicated region body
PF: predicated region fallthrough
CT: control target
= control target key end

     0   :  { %s2872_s0 = inlined_call_operand.vmem [shape: f32[2,16,32], index: 0, kind: input, shape index: {}]   ;;  %s2873_s1 = inlined_call_operand.vmem [shape: f32[16,16], index: 1, kind: input, shape index: {}]   ;;  %s2874_s2 = inlined_call_operand.vmem [shape: f32[4,32,32], index: 2, kind: input, shape index: {}]   ;;  %s2875_s3 = inlined_call_operand.vmem [shape: f32[32,128], index: 3, kind: input, shape index: {}]   ;;  %s2876_s4 = inlined_call_operand.vmem [shape: f32[1,128], index: 4, kind: input, shape index: {}]   ;;  %s2877_s5 = inlined_call_operand.vmem [shape: f32[128,32], index: 5, kind: input, shape index: {}]   ;;  %s2878_s6 = inlined_call_operand.vmem [shape: f32[1,32], index: 6, kind: input, shape index: {}]   ;;  %s2879_s7 = inlined_call_operand.vmem [shape: f32[1,32], index: 7, kind: input, shape index: {}]   ;;  %s2880_s8 = inlined_call_operand.vmem [shape: f32[1,32], index: 8, kind: input, shape index: {}]   ;;  %s2881_s9 = inlined_call_operand.vmem [shape: f32[1,32], index: 9, kind: input, shape index: {}]   ;;  %s2882_s10 = inlined_call_operand.vmem [shape: f32[1,32], index: 10, kind: input, shape index: {}]   ;;  %s2883_s11 = inlined_call_operand.vmem [shape: f32[1,32], index: 11, kind: input, shape index: {}]   ;;  %s2884_s12 = inlined_call_operand.vmem [shape: f32[1,32], index: 12, kind: input, shape index: {}]   ;;  %s2885_s13 = inlined_call_operand.hbm [shape: f32[2,16,32], index: 13, kind: output, shape index: {}]  }
   0x1   :  { %2889 = sst [smem:[#allocation7_spill]] %s2872_s0 }
   0x2   :  { %2890 = sst [smem:[#allocation8_spill]] %s2873_s1 }
   0x3   :  { %18 = vsyncpa [#allocation3], 0 }
   0x4   :  { %20 = vsyncpa [#allocation3 + $0x1], 0  ;;  %s2259_s25 = smov 0   ;;  %s2261_s26 = smov 0  }
   0x5   :  { %s2263_s27 = smov 0   ;;  %s2265_s28 = smov 0  }
   0x6 LB: > { %2891 = sst [smem:[#allocation5_spill]] %s2180_s27  ;;  %s2280_s29 = sadd.s32 4294967295, %s2184_s28   ;;  %s2184_s28 = sphi %s2265_s28, %s2918_s28   ;;  %s2180_s27 = sphi %s2263_s27, %s2915_s27   ;;  %s2176_s26 = sphi %s2261_s26, %s2917_s26   ;;  %s2172_s25 = sphi %s2259_s25, %s2916_s25  }
   0x7   : > { %s1767_s30 = sadd.s32 4294967294, %s2184_s28   ;;  %s2284_s14 = sadd.s32 1, %s2184_s28  }
   0x8   : > { %s311_s15 = sadd.s32 1, %s2180_s27  ;;  %s308_s16 = ssub.s32 %s2184_s28, %s2284_s14 }
   0x9   : > { %p321_p0 = scmp.ne.s32.totalorder %s2180_s27, %s2176_s26  ;;  %p309_p1 = scmp.eq.s32.totalorder %s308_s16, 0 }
   0xa   : > { %p322_p2 = scmp.eq.s32.totalorder %s2280_s29, 1  ;;  %p327_p3 = scmp.ne.s32.totalorder %s2176_s26, %s2172_s25 }
   0xb   : > { %p328_p4 = scmp.eq.s32.totalorder %s1767_s30, 1  ;;  %p1770_p7 = scmp.ge.s32.totalorder %s2184_s28, 1 }
   0xc   : > { %s2295_s17 = scalar_select %p309_p1, %s2180_s27, %s311_s15  }
   0xd   : > { %p2297_p5 = por %p322_p2, %p321_p0  ;;  %p2301_p6 = por %p328_p4, %p327_p3 }
   0xe   : > { %2892 = sst [smem:[#allocation6_spill]] %s2295_s17  ;;  %p390_p8 = scmp.lt.s32.totalorder %s2184_s28, 3 }
  0x10   : > { %p391_p9 = pnand %p1770_p7, %p390_p8 }
  0x11   : > { %p434_p10 = scmp.lt.s32.totalorder (!%p391_p9), %s2280_s29, 1  ;;  %s2895_s1 = sld [smem:[#allocation8_spill]] (!%p391_p9)  ;;  %vm2887_vm0 = vcmask (!%p391_p9), 130048   ;;  %v852_v5 = vld [vmem:[%s2874_s2] sm:$0xff] (!%p391_p9)  ;;  %v853_v6 = vld [vmem:[%s2874_s2 + $0x8] sm:$0xff] (!%p391_p9)  ;;  %v854_v10 = vld [vmem:[%s2874_s2 + $0x10] sm:$0xff] (!%p391_p9)  ;;  %v527_v20 = vlaneseq (!%p391_p9) }
  0x12   : > { %394 = sbr.rel (%p391_p9) target bundleno = 2224 (0x8b0), region = 72  ;;  %s2896_s0 = sld [smem:[#allocation7_spill]] (!%p391_p9)  ;;  %v1790_v7 = vld [vmem:[%s2874_s2 + $0x60] sm:$0xff] (!%p391_p9)  ;;  %v1979_v8 = vpack.c.bf16 (!%p391_p9), %v853_v6, %v852_v5  ;;  %v1791_v9 = vld [vmem:[%s2874_s2 + $0x68] sm:$0xff] (!%p391_p9)  ;;  %v855_v11 = vld [vmem:[%s2874_s2 + $0x18] sm:$0xff] (!%p391_p9)  ;;  %vm2888_vm1 = vcmask (!%p391_p9), 261120  }
  0x13   : > { %v2003_v12 = vpack.c.bf16 (!%p391_p9), %v1791_v9, %v1790_v7  ;;  %v1983_v13 = vpack.c.bf16 (!%p391_p9), %v855_v11, %v854_v10  ;;  %v1792_v14 = vld [vmem:[%s2874_s2 + $0x70] sm:$0xff] (!%p391_p9)  ;;  %v1793_v15 = vld [vmem:[%s2874_s2 + $0x78] sm:$0xff] (!%p391_p9)  ;;  %v1778_v17 = vld [vmem:[%s2874_s2 + $0x20] sm:$0xff] (!%p391_p9)  ;;  %v2353_v21 = vshrl.u32 (!%p391_p9), %v527_v20, 7  ;;  %vm550_vm2 = vcmask (!%p391_p9), 1040384   ;;  %s431_s20 = sand.u32 (!%p391_p9), 1, %s2176_s26  }
  0x14   : > { %v2007_v16 = vpack.c.bf16 (!%p391_p9), %v1793_v15, %v1792_v14  ;;  %v1779_v18 = vld [vmem:[%s2874_s2 + $0x28] sm:$0xff] (!%p391_p9)  ;;  %vm574_vm3 = vcmask (!%p391_p9), 1041408   ;;  %vm598_vm4 = vcmask (!%p391_p9), 1042432   ;;  %vm622_vm5 = vcmask (!%p391_p9), 1043456   ;;  %s1771_s27 = sshll.u32 (!%p391_p9), %s431_s20, 4  ;;  %s1814_s24 = sshll.u32 (!%p391_p9), %s2280_s29, 8 }
  0x15   : > { %2004 = vmatprep.subr.bf16.mxu0 (!%p391_p9), %v2003_v12  ;;  %v2350_v19 = vpack.c.bf16 (!%p391_p9), %v1779_v18, %v1778_v17  ;;  %v2366_v26 = vadd.s32 (!%p391_p9), 8, %v2353_v21  ;;  %vm646_vm6 = vcmask (!%p391_p9), 1044480   ;;  %vm670_vm7 = vcmask (!%p391_p9), 1045504   ;;  %s433_s30 = scalar_lea.vmem (!%p391_p9), [#allocation2], %s1771_s27  ;;  %s2186_s21 = smov (!%p391_p9), [#allocation2]  }
  0x16   : > { %2006 = vmatpush3.bf16.msra.mxu0 (!%p391_p9), %v2003_v12  ;;  %vm542_vm8 = vcmp.eq.s32.totalorder (!%p391_p9), %v2353_v21, 0  ;;  %vm568_vm9 = vcmp.eq.s32.totalorder (!%p391_p9), %v2353_v21, 1  ;;  %vm592_vm10 = vcmp.eq.s32.totalorder (!%p391_p9), %v2353_v21, 2  ;;  %vm616_vm11 = vcmp.eq.s32.totalorder (!%p391_p9), %v2353_v21, 3 }
  0x17   : > { %v441_v0 = vld [vmem:[%s2895_s1] sm:$0xff] (!%p391_p9)  ;;  %v442_v4 = vld [vmem:[%s2895_s1 + $0x8] sm:$0xff] (!%p391_p9)  ;;  %2008 = vmatprep.subr.bf16.mxu0 (!%p391_p9), %v2007_v16  ;;  %vm694_vm12 = vcmask (!%p391_p9), 1046528   ;;  %vm640_vm13 = vcmp.eq.s32.totalorder (!%p391_p9), %v2353_v21, 4  ;;  %vm664_vm14 = vcmp.eq.s32.totalorder (!%p391_p9), %v2353_v21, 5  ;;  %vm688_vm15 = vcmp.eq.s32.totalorder (!%p391_p9), %v2353_v21, 6 }
  0x18   : > { %1875 = vmatprep.mubr.msk.f32.mxu1 (!%p391_p9), %vm2887_vm0, %v441_v0 }
  0x19   : > { %s435_s22 = scalar_select %p434_p10, %s2280_s29, 1 }
  0x1a   : > { %2010 = vmatpush3.bf16.msra.mxu0 %v2007_v16  ;;  %s2831_s29 = scalar_lea.sflag [#allocation3], %s431_s20 }
  0x1b   : > { %s1813_s23 = sshll.u32 %s435_s22, 4  ;;  %s2126_s22 = sshll.u32 %s2186_s21, 4  ;;  %s2127_s22 = int_to_ptr.vmem [resolvable:$false] %s2126_s22 }
  0x1c   : > { %s438_s15 = scalar_lea.vmem %s2896_s0, %s1813_s23  ;;  %s2128_s23 = scalar_lea.vmem %s2127_s22, 512 }
  0x1d   : > { %v439_v1 = vld [vmem:[%s438_s15] sm:$0xff]  ;;  %v440_v2 = vld [vmem:[%s438_s15 + $0x8] sm:$0xff]  ;;  %s1705_s15 = sshll.u32 %s433_s30, 4  ;;  %s2827_s15 = int_to_ptr.vmem [resolvable:$true] %s1705_s15 }
  0x1e   : > { %v1975_v3 = vpack.c.bf16 %v440_v2, %v439_v1  ;;  %s2122_s27 = scalar_lea.vmem %s2827_s15, 256  ;;  %p2129_p0 = scmp.lt.s32.totalorder %s2827_s15, %s2127_s22 }
  0x1f   : > { %p2123_p11 = scmp.ne.s32.totalorder %s2827_s15, %s2122_s27  ;;  %p2130_p1 = scmp.lt.s32.totalorder %s2128_s23, %s2122_s27 }
  0x20   : > { %1976 = vmatprep.subr.bf16.mxu1 %v1975_v3 }
  0x21   : > { %1978 = vmatpush3.bf16.msra.mxu1 %v1975_v3  ;;  %p2124_p12 = pnand %p2123_p11, %p2297_p5  ;;  %p2131_p2 = por %p2130_p1, %p2129_p0 }
  0x22   : > { %1980 = vmatprep.subr.bf16.mxu1 %v1979_v8 }
  0x23   : > { %p2125_p13 = pneg %p2124_p12 }
  0x24   : > { %1876 = vmatmul.mubr.msk.f32.vlgmr.msra.gmra.mrb[0].mxu1 %vm2887_vm0, %v442_v4 }
  0x25   : > { %1982 = vmatpush3.bf16.msra.mxu1 %v1979_v8  ;;  %p2132_p3 = pnand %p2131_p2, %p2125_p13 }
  0x26   : > { %1984 = vmatprep.subr.bf16.mxu1 %v1983_v13 }
  0x29   : > { %1986 = vmatpush3.bf16.msra.mxu1 %v1983_v13 }
  0x2a   : > { %1988 = vmatprep.subr.bf16.mxu1 %v2350_v19 }
  0xf7   : > { %v2355_v22 = vpop.f32.mrb[0].mxu1 }
  0xf8   : > { %v2358_v23 = vsub.f32 %v440_v2, %v2355_v22  ;;  %v2360_v24 = vpop.f32.mrb[1].mxu1 }
  0xf9   : > { %v2363_v25 = vsub.f32 %v439_v1, %v2360_v24 }
  0xfa   : > { %v531_v27 = vmul.f32 %v2358_v23, %v2358_v23  ;;  %v551_v28 = vrot.slane %v2358_v23, 7  ;;  %v575_v29 = vrot.slane %v2358_v23, 6  ;;  %v599_v30 = vrot.slane %v2358_v23, 5 }
  0xfb   : > { %v530_v31 = vmul.f32 %v2363_v25, %v2363_v25  ;;  %v552_v32 = vrot.slane %v2363_v25, 7  ;;  %v576_v33 = vrot.slane %v2363_v25, 6  ;;  %v600_v34 = vrot.slane %v2363_v25, 5 }
  0xfc   : > { %v534_v35 = vsel %vm2888_vm1, %v531_v27, 0.0  ;;  %v623_v36 = vrot.slane %v2358_v23, 4  ;;  %v624_v37 = vrot.slane %v2363_v25, 4  ;;  %v647_v38 = vrot.slane %v2358_v23, 3 }
  0xfd   : > { %v533_v39 = vsel %vm2888_vm1, %v530_v31, 0.0  ;;  %v2384_v40 = vsel %vm550_vm2, %v551_v28, %v552_v32  ;;  %v2387_v41 = vsel %vm550_vm2, %v552_v32, %v551_v28  ;;  %v2390_v42 = vsel %vm574_vm3, %v575_v29, %v576_v33 }
  0xfe   : > { %v535_v43 = vadd.f32 %v534_v35, %v533_v39  ;;  %v557_v44 = vmul.f32 %v2384_v40, %v2363_v25  ;;  %v558_v45 = vmul.f32 %v2387_v41, %v2358_v23  ;;  %v2397_v46 = vsel %vm574_vm3, %v576_v33, %v575_v29 }
  0xff   : > { %v581_v47 = vmul.f32 %v2390_v42, %v2363_v25  ;;  %v582_v48 = vmul.f32 %v2397_v46, %v2358_v23  ;;  %v2404_v49 = vsel %vm598_vm4, %v599_v30, %v600_v34  ;;  %v2407_v50 = vsel %vm598_vm4, %v600_v34, %v599_v30 }
 0x100   : > { %v536_v51 = vrot.slane %v535_v43, 4  ;;  %v559_v52 = vsel %vm2888_vm1, %v557_v44, 0.0  ;;  %v560_v53 = vsel %vm2888_vm1, %v558_v45, 0.0  ;;  %v605_v54 = vmul.f32 %v2404_v49, %v2363_v25 }
 0x101   : > { %v561_v55 = vadd.f32 %v560_v53, %v559_v52  ;;  %v583_v56 = vsel %vm2888_vm1, %v581_v47, 0.0  ;;  %v584_v57 = vsel %vm2888_vm1, %v582_v48, 0.0  ;;  %v606_v58 = vmul.f32 %v2407_v50, %v2358_v23 }
 0x102   : > { %v537_v59 = vadd.f32 %v536_v51, %v535_v43  ;;  %v585_v60 = vadd.f32 %v584_v57, %v583_v56  ;;  %v607_v61 = vsel %vm2888_vm1, %v605_v54, 0.0  ;;  %v2420_v62 = vsel %vm622_vm5, %v623_v36, %v624_v37 }
 0x103   : > { %v562_v63 = vrot.slane %v561_v55, 4  ;;  %v608_v0 = vsel %vm2888_vm1, %v606_v58, 0.0  ;;  %v2424_v1 = vsel %vm622_vm5, %v624_v37, %v623_v36  ;;  %v629_v2 = vmul.f32 %v2420_v62, %v2363_v25 }
 0x104   : > { %v538_v3 = vrot.slane %v537_v59, 2  ;;  %v586_v4 = vrot.slane %v585_v60, 4  ;;  %v609_v5 = vadd.f32 %v608_v0, %v607_v61  ;;  %v630_v6 = vmul.f32 %v2424_v1, %v2358_v23 }
 0x105   : > { %v563_v7 = vadd.f32 %v562_v63, %v561_v55  ;;  %v631_v8 = vsel %vm2888_vm1, %v629_v2, 0.0  ;;  %v648_v9 = vrot.slane %v2363_v25, 3  ;;  %v671_v10 = vrot.slane %v2358_v23, 2 }
 0x106   : > { %v539_v11 = vadd.f32 %v538_v3, %v537_v59  ;;  %v587_v12 = vadd.f32 %v586_v4, %v585_v60  ;;  %v610_v13 = vrot.slane %v609_v5, 4  ;;  %v632_v14 = vsel %vm2888_vm1, %v630_v6, 0.0 }
 0x107   : > { %v564_v15 = vrot.slane %v563_v7, 2  ;;  %v633_v16 = vadd.f32 %v632_v14, %v631_v8  ;;  %v649_v17 = vsel %vm646_vm6, %v647_v38, %v648_v9  ;;  %v650_v18 = vsel %vm646_vm6, %v648_v9, %v647_v38 }
 0x108   : > { %v540_v20 = vrot.slane %v539_v11, 1  ;;  %v588_v27 = vrot.slane %v587_v12, 2  ;;  %v611_v28 = vadd.f32 %v610_v13, %v609_v5  ;;  %v653_v29 = vmul.f32 %v649_v17, %v2363_v25 }
 0x109   : > { %v565_v30 = vadd.f32 %v564_v15, %v563_v7  ;;  %v634_v31 = vrot.slane %v633_v16, 4  ;;  %v654_v32 = vmul.f32 %v650_v18, %v2358_v23  ;;  %v672_v33 = vrot.slane %v2363_v25, 2 }
 0x10a   : > { %v541_v34 = vadd.f32 %v540_v20, %v539_v11  ;;  %v589_v35 = vadd.f32 %v588_v27, %v587_v12  ;;  %v612_v36 = vrot.slane %v611_v28, 2  ;;  %v655_v37 = vsel %vm2888_vm1, %v653_v29, 0.0 }
 0x10b   : > { %v566_v38 = vrot.slane %v565_v30, 1  ;;  %v635_v39 = vadd.f32 %v634_v31, %v633_v16  ;;  %v656_v43 = vsel %vm2888_vm1, %v654_v32, 0.0  ;;  %v673_v44 = vsel %vm670_vm7, %v671_v10, %v672_v33 }
 0x10c   : > { %v544_v45 = vsel %vm542_vm8, %v541_v34, 0.0  ;;  %v590_v47 = vrot.slane %v589_v35, 1  ;;  %v613_v48 = vadd.f32 %v612_v36, %v611_v28  ;;  %v657_v51 = vadd.f32 %v656_v43, %v655_v37 }
 0x10d   : > { %v567_v52 = vadd.f32 %v566_v38, %v565_v30  ;;  %v636_v53 = vrot.slane %v635_v39, 2  ;;  %v674_v54 = vsel %vm670_vm7, %v672_v33, %v671_v10  ;;  %v677_v55 = vmul.f32 %v673_v44, %v2363_v25 }
 0x10e   : > { %v591_v56 = vadd.f32 %v590_v47, %v589_v35  ;;  %v614_v57 = vrot.slane %v613_v48, 1  ;;  %v658_v58 = vrot.slane %v657_v51, 4  ;;  %v678_v59 = vmul.f32 %v674_v54, %v2358_v23 }
 0x10f   : > { %v570_v60 = vsel %vm568_vm9, %v567_v52, 0.0  ;;  %v637_v61 = vadd.f32 %v636_v53, %v635_v39  ;;  %v679_v63 = vsel %vm2888_vm1, %v677_v55, 0.0  ;;  %v695_v0 = vrot.slane %v2358_v23, 1 }
 0x110   : > { %v572_v2 = vadd.f32 %v570_v60, %v544_v45  ;;  %v594_v3 = vsel %vm592_vm10, %v591_v56, 0.0  ;;  %v615_v4 = vadd.f32 %v614_v57, %v613_v48  ;;  %v659_v5 = vadd.f32 %v658_v58, %v657_v51 }
 0x111   : > { %v638_v6 = vrot.slane %v637_v61, 1  ;;  %v680_v7 = vsel %vm2888_vm1, %v678_v59, 0.0  ;;  %v696_v8 = vrot.slane %v2363_v25, 1  ;;  %v784_v9 = vmul.f32 %v2424_v1, %v2363_v25 }
 0x112   : > { %v596_v10 = vadd.f32 %v594_v3, %v572_v2  ;;  %v618_v11 = vsel %vm616_vm11, %v615_v4, 0.0  ;;  %v660_v12 = vrot.slane %v659_v5, 2  ;;  %v681_v13 = vadd.f32 %v680_v7, %v679_v63 }
 0x113   : > { %v639_v14 = vadd.f32 %v638_v6, %v637_v61  ;;  %v697_v15 = vsel %vm694_vm12, %v695_v0, %v696_v8  ;;  %v698_v16 = vsel %vm694_vm12, %v696_v8, %v695_v0  ;;  %v785_v20 = vmul.f32 %v2420_v62, %v2358_v23 }
 0x114   : > { %v620_v27 = vadd.f32 %v618_v11, %v596_v10  ;;  %v661_v28 = vadd.f32 %v660_v12, %v659_v5  ;;  %v682_v29 = vrot.slane %v681_v13, 4  ;;  %v701_v30 = vmul.f32 %v697_v15, %v2363_v25 }
 0x115   : > { %v642_v1 = vsel %vm640_vm13, %v639_v14, 0.0  ;;  %v702_v31 = vmul.f32 %v698_v16, %v2358_v23  ;;  %v801_v32 = vmul.f32 %v650_v18, %v2363_v25  ;;  %v802_v33 = vmul.f32 %v649_v17, %v2358_v23 }
 0x116   : > { %v644_v34 = vadd.f32 %v642_v1, %v620_v27  ;;  %v662_v35 = vrot.slane %v661_v28, 1  ;;  %v683_v36 = vadd.f32 %v682_v29, %v681_v13  ;;  %v703_v62 = vsel %vm2888_vm1, %v701_v30, 0.0 }
 0x117   : > { %v704_v37 = vsel %vm2888_vm1, %v702_v31, 0.0  ;;  %v818_v38 = vmul.f32 %v674_v54, %v2363_v25  ;;  %v2479_v39 = vmul.f32 %v673_v44, %v2358_v23  ;;  %v2482_v43 = vmul.f32 %v698_v16, %v2363_v25 }
 0x118   : > { %v663_v45 = vadd.f32 %v662_v35, %v661_v28  ;;  %v684_v47 = vrot.slane %v683_v36, 2  ;;  %v705_v18 = vadd.f32 %v704_v37, %v703_v62  ;;  %v2485_v17 = vmul.f32 %v697_v15, %v2358_v23 }
 0x119   : > { %v718_v48 = vmul.f32 %v2358_v23, %v2363_v25  ;;  %v733_v51 = vmul.f32 %v2387_v41, %v2363_v25  ;;  %v734_v52 = vmul.f32 %v2384_v40, %v2358_v23  ;;  %v750_v44 = vmul.f32 %v2397_v46, %v2363_v25 }
 0x11a   : > { %v666_v53 = vsel %vm664_vm14, %v663_v45, 0.0  ;;  %v685_v54 = vadd.f32 %v684_v47, %v683_v36  ;;  %v706_v55 = vrot.slane %v705_v18, 4  ;;  %v751_v56 = vmul.f32 %v2390_v42, %v2358_v23 }
 0x11b   : > { %v668_v57 = vadd.f32 %v666_v53, %v644_v34  ;;  %vm712_vm2 = vcmp.eq.s32.totalorder %v2353_v21, 7  ;;  %v719_v58 = vsel %vm2888_vm1, %v718_v48, 0.0  ;;  %v735_v59 = vsel %vm2888_vm1, %v733_v51, 0.0 }
 0x11c   : > { %v736_v60 = vsel %vm2888_vm1, %v734_v52, 0.0  ;;  %v686_v61 = vrot.slane %v685_v54, 1  ;;  %v707_v63 = vadd.f32 %v706_v55, %v705_v18  ;;  %v720_v0 = vadd.f32 %v719_v58, %v719_v58 }
 0x11d   : > { %v737_v2 = vadd.f32 %v736_v60, %v735_v59  ;;  %v752_v3 = vsel %vm2888_vm1, %v750_v44, 0.0  ;;  %v753_v4 = vsel %vm2888_vm1, %v751_v56, 0.0  ;;  %v767_v5 = vmul.f32 %v2407_v50, %v2363_v25 }
 0x11e   : > { %v768_v6 = vmul.f32 %v2404_v49, %v2358_v23  ;;  %v687_v7 = vadd.f32 %v686_v61, %v685_v54  ;;  %v708_v8 = vrot.slane %v707_v63, 2  ;;  %v721_v10 = vrot.slane %v720_v0, 4 }
 0x11f   : > { %v738_v11 = vrot.slane %v737_v2, 4  ;;  %vm728_vm3 = vcmp.eq.s32.totalorder %v2366_v26, 8  ;;  %vm745_vm4 = vcmp.eq.s32.totalorder %v2366_v26, 9  ;;  %v754_v12 = vadd.f32 %v753_v4, %v752_v3 }
 0x120   : > { %v769_v13 = vsel %vm2888_vm1, %v767_v5, 0.0  ;;  %v770_v14 = vsel %vm2888_vm1, %v768_v6, 0.0  ;;  %v786_v15 = vsel %vm2888_vm1, %v784_v9, 0.0  ;;  %v690_v16 = vsel %vm688_vm15, %v687_v7, 0.0 }
 0x121   : > { %v709_v27 = vadd.f32 %v708_v8, %v707_v63  ;;  %v722_v28 = vadd.f32 %v721_v10, %v720_v0  ;;  %v739_v29 = vadd.f32 %v738_v11, %v737_v2  ;;  %v692_v30 = vadd.f32 %v690_v16, %v668_v57 }
 0x122   : > { %v755_v1 = vrot.slane %v754_v12, 4  ;;  %v771_v31 = vadd.f32 %v770_v14, %v769_v13  ;;  %v787_v34 = vsel %vm2888_vm1, %v785_v20, 0.0  ;;  %vm762_vm5 = vcmp.eq.s32.totalorder %v2366_v26, 10 }
 0x123   : > { %v710_v35 = vrot.slane %v709_v27, 1  ;;  %v723_v36 = vrot.slane %v722_v28, 2  ;;  %v740_v62 = vrot.slane %v739_v29, 2  ;;  %v788_v37 = vadd.f32 %v787_v34, %v786_v15 }
 0x124   : > { %v756_v45 = vadd.f32 %v755_v1, %v754_v12  ;;  %v772_v47 = vrot.slane %v771_v31, 4  ;;  %v803_v9 = vsel %vm2888_vm1, %v801_v32, 0.0  ;;  %v804_v18 = vsel %vm2888_vm1, %v802_v33, 0.0 }
 0x125   : > { %v711_v48 = vadd.f32 %v710_v35, %v709_v27  ;;  %v724_v51 = vadd.f32 %v723_v36, %v722_v28  ;;  %v741_v52 = vadd.f32 %v740_v62, %v739_v29  ;;  %v789_v44 = vrot.slane %v788_v37, 4 }
 0x126   : > { %v757_v53 = vrot.slane %v756_v45, 2  ;;  %v773_v54 = vadd.f32 %v772_v47, %v771_v31  ;;  %v805_v55 = vadd.f32 %v804_v18, %v803_v9  ;;  %v820_v20 = vsel %vm2888_vm1, %v818_v38, 0.0 }
 0x127   : > { %v714_v56 = vsel %vm712_vm2, %v711_v48, 0.0  ;;  %v725_v57 = vrot.slane %v724_v51, 1  ;;  %v742_v58 = vrot.slane %v741_v52, 1  ;;  %v790_v59 = vadd.f32 %v789_v44, %v788_v37 }
 0x128   : > { %v2523_v60 = vadd.f32 %v714_v56, %v692_v30  ;;  %v758_v32 = vadd.f32 %v757_v53, %v756_v45  ;;  %v774_v61 = vrot.slane %v773_v54, 2  ;;  %v806_v33 = vrot.slane %v805_v55, 4 }
 0x129   : > { %v726_v63 = vadd.f32 %v725_v57, %v724_v51  ;;  %v743_v0 = vadd.f32 %v742_v58, %v741_v52  ;;  %v791_v2 = vrot.slane %v790_v59, 2  ;;  %v821_v3 = vsel %vm2888_vm1, %v2479_v39, 0.0  ;;  %v1780_v58 = vld [vmem:[%s2874_s2 + $0x30] sm:$0xff] }
 0x12a   : > { %1886 = vmatprep.mubr.msk.f32.mxu1 %vm2888_vm1, %v2523_v60  ;;  %1919 = vmatprep.mubr.msk.f32.mxu0 %vm2888_vm1, %v2523_v60  ;;  %v759_v21 = vrot.slane %v758_v32, 1  ;;  %v775_v38 = vadd.f32 %v774_v61, %v773_v54  ;;  %v807_v4 = vadd.f32 %v806_v33, %v805_v55  ;;  %v822_v5 = vadd.f32 %v821_v3, %v820_v20  ;;  %v1787_v3 = vld [vmem:[%s2874_s2 + $0x58] sm:$0xff] }
 0x12b   : > { %v730_v6 = vsel %vm728_vm3, %v726_v63, 0.0  ;;  %v747_v7 = vsel %vm745_vm4, %v743_v0, 0.0  ;;  %v792_v8 = vadd.f32 %v791_v2, %v790_v59  ;;  %v837_v39 = vsel %vm2888_vm1, %v2482_v43, 0.0  ;;  %v1781_v59 = vld [vmem:[%s2874_s2 + $0x38] sm:$0xff]  ;;  %v1784_v63 = vld [vmem:[%s2874_s2 + $0x40] sm:$0xff]  ;;  %v1786_v2 = vld [vmem:[%s2874_s2 + $0x50] sm:$0xff] }
 0x12c   : > { %v749_v10 = vadd.f32 %v747_v7, %v730_v6  ;;  %v760_v11 = vadd.f32 %v759_v21, %v758_v32  ;;  %v776_v12 = vrot.slane %v775_v38, 1  ;;  %v808_v13 = vrot.slane %v807_v4, 2 }
 0x12d   : > { %vm779_vm6 = vcmp.eq.s32.totalorder %v2366_v26, 11  ;;  %v793_v14 = vrot.slane %v792_v8, 1  ;;  %v823_v15 = vrot.slane %v822_v5, 4  ;;  %v838_v16 = vsel %vm2888_vm1, %v2485_v17, 0.0 }
 0x12e   : > { %v764_v27 = vsel %vm762_vm5, %v760_v11, 0.0  ;;  %v777_v28 = vadd.f32 %v776_v12, %v775_v38  ;;  %v809_v29 = vadd.f32 %v808_v13, %v807_v4  ;;  %v839_v30 = vadd.f32 %v838_v16, %v837_v39 }
 0x12f   : > { %v766_v1 = vadd.f32 %v764_v27, %v749_v10  ;;  %v794_v31 = vadd.f32 %v793_v14, %v792_v8  ;;  %vm796_vm7 = vcmp.eq.s32.totalorder %v2366_v26, 12  ;;  %v824_v43 = vadd.f32 %v823_v15, %v822_v5 }
 0x130   : > { %v781_v34 = vsel %vm779_vm6, %v777_v28, 0.0  ;;  %v810_v35 = vrot.slane %v809_v29, 1  ;;  %v840_v36 = vrot.slane %v839_v30, 4  ;;  %vm813_vm8 = vcmp.eq.s32.totalorder %v2366_v26, 13 }
 0x131   : > { %v783_v62 = vadd.f32 %v781_v34, %v766_v1  ;;  %v825_v37 = vrot.slane %v824_v43, 2  ;;  %v798_v45 = vsel %vm796_vm7, %v794_v31, 0.0  ;;  %vm830_vm9 = vcmp.eq.s32.totalorder %v2366_v26, 14 }
 0x132   : > { %v811_v47 = vadd.f32 %v810_v35, %v809_v29  ;;  %v841_v17 = vadd.f32 %v840_v36, %v839_v30  ;;  %vm847_vm10 = vcmp.eq.s32.totalorder %v2366_v26, 15  ;;  %v1991_v33 = vpack.c.bf16 %v1781_v59, %v1780_v58  ;;  %v1785_v26 = vld [vmem:[%s2874_s2 + $0x48] sm:$0xff] }
 0x133   : > { %v800_v9 = vadd.f32 %v798_v45, %v783_v62  ;;  %v826_v18 = vadd.f32 %v825_v37, %v824_v43  ;;  %v1995_v0 = vpack.c.bf16 %v1785_v26, %v1784_v63  ;;  %v1999_v21 = vpack.c.bf16 %v1787_v3, %v1786_v2 }
 0x134   : > { %v842_v48 = vrot.slane %v841_v17, 2  ;;  %v815_v51 = vsel %vm813_vm8, %v811_v47, 0.0 }
 0x135   : > { %v827_v52 = vrot.slane %v826_v18, 1  ;;  %v817_v44 = vadd.f32 %v815_v51, %v800_v9 }
 0x136   : > { %v843_v53 = vadd.f32 %v842_v48, %v841_v17 }
 0x137   : > { %v828_v54 = vadd.f32 %v827_v52, %v826_v18 }
 0x138   : > { %v844_v55 = vrot.slane %v843_v53, 1 }
 0x139   : > { %v832_v20 = vsel %vm830_vm9, %v828_v54, 0.0 }
 0x13a   : > { %v834_v56 = vadd.f32 %v832_v20, %v817_v44  ;;  %v845_v57 = vadd.f32 %v844_v55, %v843_v53 }
 0x13c   : > { %v849_v32 = vsel %vm847_vm10, %v845_v57, 0.0 }
 0x13d   : > { %v851_v61 = vadd.f32 %v849_v32, %v834_v56 }
 0x13f   : > { %1887 = vmatmul.mubr.msk.f32.vlgmr.msra.gmra.mrb[2].mxu1 %vm2888_vm1, %v851_v61  ;;  %1920 = vmatmul.mubr.msk.f32.vlgmr.msra.gmra.mrb[0].mxu0 %vm2888_vm1, %v851_v61 }
 0x140   : > { %1990 = vmatpush3.bf16.msra.mxu1 %v2350_v19  ;;  %1897 = vmatprep.mubr.msk.f32.mxu1 %vm2888_vm1, %v2523_v60 }
 0x141   : > { %1992 = vmatprep.subr.bf16.mxu1 %v1991_v33 }
 0x144   : > { %1994 = vmatpush3.bf16.msra.mxu1 %v1991_v33 }
 0x145   : > { %1996 = vmatprep.subr.bf16.mxu1 %v1995_v0 }
 0x147   : > { %1898 = vmatmul.mubr.msk.f32.vlgmr.msra.gmra.mrb[4].mxu1 %vm2888_vm1, %v851_v61 }
 0x148   : > { %1998 = vmatpush3.bf16.msra.mxu1 %v1995_v0  ;;  %1908 = vmatprep.mubr.msk.f32.mxu1 %vm2888_vm1, %v2523_v60 }
 0x149   : > { %2000 = vmatprep.subr.bf16.mxu1 %v1999_v21 }
 0x14c   : > { %2002 = vmatpush3.bf16.msra.mxu1 %v1999_v21 }
 0x14f   : > { %1909 = vmatmul.mubr.msk.f32.vlgmr.msra.gmra.mrb[6].mxu1 %vm2888_vm1, %v851_v61 }
 0x212   : > { %v2573_v19 = vpop.f32.mrb[2].mxu1  ;;  %v2575_v38 = vpop.f32.mrb[0].mxu0 }
 0x213   : > { %v2577_v4 = vpop.f32.mrb[3].mxu1  ;;  %v2579_v5 = vpop.f32.mrb[1].mxu0 }
 0x21a   : > { %v2581_v6 = vpop.f32.mrb[4].mxu1 }
 0x21b   : > { %v1178_v7 = vmax.f32 %v2573_v19, %v2581_v6  ;;  %v2585_v8 = vpop.f32.mrb[5].mxu1 }
 0x21c   : > { %v1177_v60 = vmax.f32 %v2577_v4, %v2585_v8 }
 0x222   : > { %v2589_v39 = vpop.f32.mrb[6].mxu1 }
 0x223   : > { %v1180_v10 = vmax.f32 %v1178_v7, %v2589_v39  ;;  %v2592_v11 = vpop.f32.mrb[7].mxu1 }
 0x224   : > { %v1179_v12 = vmax.f32 %v1177_v60, %v2592_v11 }
 0x225   : > { %v2596_v13 = vmax.f32 %v1180_v10, %v2575_v38 }
 0x226   : > { %v2599_v14 = vmax.f32 %v1179_v12, %v2579_v5 }
 0x227   : > { %vm1184_vm11 = vcmp.eq.f32.partialorder %v2573_v19, %v2596_v13  ;;  %vm1186_vm12 = vcmp.eq.f32.partialorder %v2581_v6, %v2596_v13  ;;  %vm1188_vm13 = vcmp.eq.f32.partialorder %v2589_v39, %v2596_v13  ;;  %vm1190_vm14 = vcmp.eq.f32.partialorder %v2575_v38, %v2596_v13 }
 0x228   : > { %v1192_v15 = vsel %vm1184_vm11, -1e+30, %v2573_v19  ;;  %v1194_v16 = vsel %vm1186_vm12, -1e+30, %v2581_v6  ;;  %v1196_v27 = vsel %vm1188_vm13, -1e+30, %v2589_v39  ;;  %vm1183_vm15 = vcmp.eq.f32.partialorder %v2577_v4, %v2599_v14 }
 0x229   : > { %v1198_v28 = vsel %vm1190_vm14, -1e+30, %v2575_v38  ;;  %v1200_v29 = vmax.f32 %v1192_v15, %v1194_v16  ;;  %vm1185_vm2 = vcmp.eq.f32.partialorder %v2585_v8, %v2599_v14  ;;  %v1214_v30 = vsub.f32 %v2596_v13, %v2596_v13 }
 0x22a   : > { %vm1187_vm3 = vcmp.eq.f32.partialorder %v2592_v11, %v2599_v14  ;;  %vm1189_vm4 = vcmp.eq.f32.partialorder %v2579_v5, %v2599_v14  ;;  %v1191_v1 = vsel %vm1183_vm15, -1e+30, %v2577_v4  ;;  %v1193_v43 = vsel %vm1185_vm2, -1e+30, %v2585_v8 }
 0x22b   : > { %v1202_v31 = vmax.f32 %v1200_v29, %v1196_v27  ;;  %v1195_v34 = vsel %vm1187_vm3, -1e+30, %v2592_v11  ;;  %v2651_v35 = vsel %vm1189_vm4, -1e+30, %v2579_v5  ;;  %v1199_v36 = vmax.f32 %v1191_v1, %v1193_v43 }
 0x22c   : > { %v1213_v37 = vsub.f32 %v2599_v14, %v2599_v14  ;;  %v1217_v45 = vmul.f32 1.442695, %v1214_v30 }
 0x22d   : > { %v1204_v62 = vmax.f32 %v1202_v31, %v1198_v28  ;;  %v1201_v47 = vmax.f32 %v1199_v36, %v1195_v34 }
 0x22e   : > { %v1215_v18 = vmul.f32 1.442695, %v1213_v37  ;;  %2096 = vpow2.f32 %v1217_v45 }
 0x22f   : > { %vm1206_vm5 = vcmp.eq.f32.partialorder %v1192_v15, %v1204_v62  ;;  %vm1208_vm6 = vcmp.eq.f32.partialorder %v1194_v16, %v1204_v62  ;;  %vm1210_vm7 = vcmp.eq.f32.partialorder %v1196_v27, %v1204_v62  ;;  %vm1212_vm8 = vcmp.eq.f32.partialorder %v1198_v28, %v1204_v62 }
 0x230   : > { %v1220_v17 = vsub.f32 %v1204_v62, %v2596_v13  ;;  %v1203_v9 = vmax.f32 %v1201_v47, %v2651_v35 }
 0x232   : > { %v1223_v48 = vmul.f32 1.442695, %v1220_v17  ;;  %vm1205_vm9 = vcmp.eq.f32.partialorder %v1191_v1, %v1203_v9  ;;  %vm1207_vm10 = vcmp.eq.f32.partialorder %v1193_v43, %v1203_v9  ;;  %vm1209_vm0 = vcmp.eq.f32.partialorder %v1195_v34, %v1203_v9 }
 0x233   : > { %vm1211_vm1 = vcmp.eq.f32.partialorder %v2651_v35, %v1203_v9  ;;  %v1219_v51 = vsub.f32 %v1203_v9, %v2599_v14 }
 0x234   : > { %2098 = vpow2.f32 %v1223_v48 }
 0x235   : > { %v1221_v52 = vmul.f32 1.442695, %v1219_v51  ;;  %2100 = vpow2.f32 %v1215_v18 }
 0x237   : > { %2102 = vpow2.f32 %v1221_v52 }
 0x238   : > { %v2097_v44 = vpop.eup %2096 }
 0x23e   : > { %v2099_v53 = vpop.eup %2098 }
 0x23f   : > { %v1226_v54 = vadd.f32 %v2099_v53, %v2097_v44  ;;  %v2101_v55 = vpop.eup %2100 }
 0x241   : > { %v2103_v20 = vpop.eup %2102  ;;  %2104 = vrcp.f32 %v1226_v54  ;;  %v1328_v54 = vld [vmem:[%s2875_s3] sm:$0xff] }
 0x242   : > { %v1225_v56 = vadd.f32 %v2103_v20, %v2101_v55 }
 0x244   : > { %2106 = vrcp.f32 %v1225_v56 }
 0x24b   : > { %v2105_v57 = vpop.eup %2104 }
 0x24c   : > { %v1230_v58 = vmul.f32 %v2105_v57, %v2097_v44  ;;  %v1232_v59 = vmul.f32 %v2105_v57, %v2099_v53  ;;  %v1331_v57 = vld [vmem:[%s2875_s3 + $0x18] sm:$0xff] }
 0x24e   : > { %v2107_v32 = vpop.eup %2106  ;;  %v1234_v61 = vsel %vm1184_vm11, %v1230_v58, 0.0  ;;  %v1238_v33 = vsel %vm1206_vm5, %v1232_v59, 0.0  ;;  %v1246_v63 = vsel %vm1186_vm12, %v1230_v58, 0.0  ;;  %v1250_v26 = vsel %vm1208_vm6, %v1232_v59, 0.0 }
 0x24f   : > { %v1240_v0 = vadd.f32 %v1238_v33, %v1234_v61  ;;  %v1252_v2 = vadd.f32 %v1250_v26, %v1246_v63  ;;  %v1258_v3 = vsel %vm1188_vm13, %v1230_v58, 0.0  ;;  %v1262_v21 = vsel %vm1210_vm7, %v1232_v59, 0.0  ;;  %v1424_v61 = vld [vmem:[%s2877_s5 + $0x10] sm:$0xff]  ;;  %v1425_v63 = vld [vmem:[%s2877_s5 + $0x18] sm:$0xff] }
 0x250   : > { %v1264_v7 = vadd.f32 %v1262_v21, %v1258_v3  ;;  %v1228_v60 = vmul.f32 %v2107_v32, %v2101_v55  ;;  %v1231_v19 = vmul.f32 %v2107_v32, %v2103_v20  ;;  %v1270_v10 = vsel %vm1190_vm14, %v1230_v58, 0.0  ;;  %v1329_v55 = vld [vmem:[%s2875_s3 + $0x8] sm:$0xff]  ;;  %v1330_v20 = vld [vmem:[%s2875_s3 + $0x10] sm:$0xff] }
 0x251   : > { %v1242_v6 = vmul.f32 %v1240_v0, %v2358_v23  ;;  %v1254_v12 = vmul.f32 %v1252_v2, %v2387_v41  ;;  %v1274_v15 = vsel %vm1212_vm8, %v1232_v59, 0.0  ;;  %v2011_v56 = vpack.c.bf16 %v1329_v55, %v1328_v54  ;;  %v1422_v59 = vld [vmem:[%s2877_s5] sm:$0xff]  ;;  %v1423_v32 = vld [vmem:[%s2877_s5 + $0x8] sm:$0xff]  ;;  %v1428_v21 = vld [vmem:[%s2877_s5 + $0x30] sm:$0xff] }
 0x252   : > { %v1266_v16 = vmul.f32 %v1264_v7, %v2397_v46  ;;  %v1233_v39 = vsel %vm1183_vm15, %v1228_v60, 0.0  ;;  %v1237_v27 = vsel %vm1205_vm9, %v1231_v19, 0.0  ;;  %v1245_v29 = vsel %vm1185_vm2, %v1228_v60, 0.0  ;;  %v1426_v0 = vld [vmem:[%s2877_s5 + $0x20] sm:$0xff]  ;;  %v1427_v2 = vld [vmem:[%s2877_s5 + $0x28] sm:$0xff]  ;;  %v1429_v7 = vld [vmem:[%s2877_s5 + $0x38] sm:$0xff] }
 0x253   : > { %v1239_v38 = vadd.f32 %v1237_v27, %v1233_v39  ;;  %v1249_v13 = vsel %vm1207_vm10, %v1231_v19, 0.0  ;;  %v1257_v41 = vsel %vm1187_vm3, %v1228_v60, 0.0  ;;  %v1261_v28 = vsel %vm1209_vm0, %v1231_v19, 0.0  ;;  %2012 = vmatprep.subr.bf16.mxu1 %v2011_v56  ;;  %v1434_v39 = vld [vmem:[%s2877_s5 + $0x60] sm:$0xff]  ;;  %v1435_v27 = vld [vmem:[%s2877_s5 + $0x68] sm:$0xff] }
 0x254   : > { %v1251_v46 = vadd.f32 %v1249_v13, %v1245_v29  ;;  %v1263_v30 = vadd.f32 %v1261_v28, %v1257_v41  ;;  %v1269_v4 = vsel %vm1189_vm4, %v1228_v60, 0.0  ;;  %v1273_v1 = vsel %vm1211_vm1, %v1231_v19, 0.0  ;;  %2014 = vmatpush3.bf16.msra.mxu1 %v2011_v56  ;;  %v1430_v19 = vld [vmem:[%s2877_s5 + $0x40] sm:$0xff] }
 0x255   : > { %v1241_v8 = vmul.f32 %v1239_v38, %v2363_v25  ;;  %v1275_v31 = vadd.f32 %v1273_v1, %v1269_v4  ;;  %v1256_v43 = vadd.f32 %v1254_v12, %v1242_v6  ;;  %v1276_v36 = vadd.f32 %v1274_v15, %v1270_v10  ;;  %v1431_v10 = vld [vmem:[%s2877_s5 + $0x48] sm:$0xff]  ;;  %v1432_v12 = vld [vmem:[%s2877_s5 + $0x50] sm:$0xff]  ;;  %v1433_v15 = vld [vmem:[%s2877_s5 + $0x58] sm:$0xff] }
 0x256   : > { %v1253_v62 = vmul.f32 %v1251_v46, %v2384_v40  ;;  %v1265_v37 = vmul.f32 %v1263_v30, %v2390_v42  ;;  %vm2897_vm0 = vcmask 261120   ;;  %v2015_v58 = vpack.c.bf16 %v1331_v57, %v1330_v20  ;;  %v1796_v1 = vld [vmem:[%s2879_s7] ss:$0 sm:$0xff] }
 0x257   : > { %v1268_v11 = vadd.f32 %v1266_v16, %v1256_v43  ;;  %v1278_v34 = vmul.f32 %v1276_v36, %v2407_v50  ;;  %v1277_v5 = vmul.f32 %v1275_v31, %v2404_v49  ;;  %vm2898_vm1 = vmmov %vm2897_vm0  ;;  %v2019_v33 = vpack.c.bf16 %v1423_v32, %v1422_v59  ;;  %v1797_v31 = vld [vmem:[%s2880_s8] ss:$0 sm:$0xff] }
 0x258   : > { %v1255_v45 = vadd.f32 %v1253_v62, %v1241_v8  ;;  %vm2899_vm11 = vmmov %vm2897_vm0  ;;  %2016 = vmatprep.subr.bf16.mxu1 %v2015_v58  ;;  %v2023_v26 = vpack.c.bf16 %v1425_v63, %v1424_v61  ;;  %v2027_v3 = vpack.c.bf16 %v1427_v2, %v1426_v0  ;;  %v2031_v60 = vpack.c.bf16 %v1429_v7, %v1428_v21 }
 0x259   : > { %v1280_v47 = vadd.f32 %v1278_v34, %v1268_v11  ;;  %vm2900_vm12 = vmmov %vm2897_vm0  ;;  %2018 = vmatpush3.bf16.msra.mxu1 %v2015_v58  ;;  %2020 = vmatprep.subr.bf16.mxu0 %v2019_v33  ;;  %v2035_v6 = vpack.c.bf16 %v1431_v10, %v1430_v19  ;;  %v2039_v16 = vpack.c.bf16 %v1433_v15, %v1432_v12  ;;  %vm2903_vm15 = vcmask 130048   ;;  %v1802_v19 = vld [vmem:[%s2881_s9] ss:$0 sm:$0xff] }
 0x25a   : > { %v1267_v17 = vadd.f32 %v1265_v37, %v1255_v45  ;;  %2022 = vmatpush3.bf16.msra.mxu0 %v2019_v33  ;;  %v2043_v29 = vpack.c.bf16 %v1435_v27, %v1434_v39  ;;  %vm2901_vm13 = vmmov %vm2897_vm0  ;;  %v2120_v45 = vld [vmem:[%s2895_s1] sm:$0xff] }
 0x25b   : > { %v1282_v18 = vadd.f32 %v1280_v47, %v2358_v23  ;;  %2024 = vmatprep.subr.bf16.mxu0 %v2023_v26  ;;  %vm2902_vm14 = vmmov %vm2897_vm0  ;;  %v1436_v47 = vld [vmem:[%s2877_s5 + $0x70] sm:$0xff]  ;;  %v1803_v12 = vld [vmem:[%s2882_s10] ss:$0 sm:$0xff] }
 0x25c   : > { %v1279_v14 = vadd.f32 %v1277_v5, %v1267_v17  ;;  %v1437_v17 = vld [vmem:[%s2877_s5 + $0x78] sm:$0xff]  ;;  %vm2904_vm2 = vmmov %vm2897_vm0 }
 0x25d   : > { %v1288_v40 = vsel %vm2898_vm1, %v1282_v18, 0.0  ;;  %v2047_v5 = vpack.c.bf16 %v1437_v17, %v1436_v47  ;;  %vm2905_vm3 = vmmov %vm2897_vm0 }
 0x25e   : > { %v1281_v35 = vadd.f32 %v1279_v14, %v2363_v25  ;;  %2026 = vmatpush3.bf16.msra.mxu0 %v2023_v26  ;;  %v1798_v14 = vld [vmem:[%s2876_s4] ss:$0 sm:$0xff]  ;;  %vm2906_vm4 = vmmov %vm2897_vm0 }
 0x25f   : > { %2028 = vmatprep.subr.bf16.mxu0 %v2027_v3  ;;  %vm2907_vm5 = vmmov %vm2897_vm0 }
 0x260   : > { %v1285_v9 = vsel %vm2897_vm0, %v1281_v35, 0.0  ;;  %vm2908_vm6 = vmmov %vm2903_vm15 }
 0x261   : > { %1286 = vadd.xlane.f32.xlu0 %v1285_v9  ;;  %vm2909_vm7 = vmmov %vm2897_vm0 }
 0x262   : > { %2030 = vmatpush3.bf16.msra.mxu0 %v2027_v3  ;;  %vm2910_vm8 = vmmov %vm2897_vm0 }
 0x263   : > { %2032 = vmatprep.subr.bf16.mxu0 %v2031_v60  ;;  %vm2911_vm9 = vmmov %vm2897_vm0 }
 0x264   : > { %vm2912_vm10 = vmmov %vm2897_vm0 }
 0x265   : > { %1289 = vadd.xlane.f32.xlu0 %v1288_v40  ;;  %vm2913_vm1 = vmmov %vm2897_vm0 }
 0x266   : > { %2034 = vmatpush3.bf16.msra.mxu0 %v2031_v60 }
 0x267   : > { %2036 = vmatprep.subr.bf16.mxu0 %v2035_v6 }
 0x26a   : > { %2038 = vmatpush3.bf16.msra.mxu0 %v2035_v6 }
 0x26b   : > { %2040 = vmatprep.subr.bf16.mxu0 %v2039_v16 }
 0x26e   : > { %2042 = vmatpush3.bf16.msra.mxu0 %v2039_v16 }
 0x26f   : > { %2044 = vmatprep.subr.bf16.mxu0 %v2043_v29 }
 0x272   : > { %2046 = vmatpush3.bf16.msra.mxu0 %v2043_v29 }
 0x273   : > { %2048 = vmatprep.subr.bf16.mxu0 %v2047_v5 }
 0x276   : > { %2050 = vmatpush3.bf16.msra.mxu0 %v2047_v5 }
 0x2ee   : > { %v1287_v48 = vpop.xlane.xlu0 %1286 }
 0x2ef   : > { %v1292_v50 = vmul.f32 0.03125, %v1287_v48 }
 0x2f1   : > { %v2704_v51 = vsub.f32 %v1281_v35, %v1292_v50 }
 0x2f2   : > { %v1290_v42 = vpop.xlane.xlu0 %1289 }
 0x2f3   : > { %v1293_v52 = vmul.f32 0.03125, %v1290_v42  ;;  %v1296_v49 = vmul.f32 %v2704_v51, %v2704_v51 }
 0x2f5   : > { %v2708_v44 = vsub.f32 %v1282_v18, %v1293_v52  ;;  %v1298_v25 = vsel %vm2899_vm11, %v1296_v49, 0.0 }
 0x2f6   : > { %1299 = vadd.xlane.f32.xlu1 %v1298_v25 }
 0x2f7   : > { %v1297_v23 = vmul.f32 %v2708_v44, %v2708_v44 }
 0x2f9   : > { %v1301_v53 = vsel %vm2900_vm12, %v1297_v23, 0.0 }
 0x2fa   : > { %1302 = vadd.xlane.f32.xlu1 %v1301_v53 }
 0x383   : > { %v1300_v38 = vpop.xlane.xlu1 %1299 }
 0x384   : > { %v1304_v13 = vmul.f32 0.03125, %v1300_v38 }
 0x386   : > { %v1306_v41 = vadd.f32 1e-05, %v1304_v13 }
 0x387   : > { %v1303_v28 = vpop.xlane.xlu1 %1302 }
 0x388   : > { %2108 = vrsqrt.f32 %v1306_v41  ;;  %v1305_v46 = vmul.f32 0.03125, %v1303_v28  ;;  %v2121_v28 = vld [vmem:[%s2895_s1 + $0x8] sm:$0xff]  ;;  %s2825_s1 = scalar_lea.hbm %s2885_s13, %s1814_s24 }
 0x38a   : > { %v1307_v30 = vadd.f32 1e-05, %v1305_v46 }
 0x38c   : > { %2110 = vrsqrt.f32 %v1307_v30 }
 0x392   : > { %v2109_v4 = vpop.eup %2108 }
 0x393   : > { %v1310_v8 = vmul.f32 %v2109_v4, %v2704_v51  ;;  %v1801_v51 = vld [vmem:[%s2878_s6] ss:$0 sm:$0xff] }
 0x395   : > { %v1318_v43 = vmul.f32 %v1796_v1, %v1310_v8 }
 0x396   : > { %v2111_v36 = vpop.eup %2110 }
 0x397   : > { %v1311_v62 = vmul.f32 %v2111_v36, %v2708_v44  ;;  %v1326_v11 = vadd.f32 %v1797_v31, %v1318_v43 }
 0x399   : > { %v1319_v34 = vmul.f32 %v1796_v1, %v1311_v62  ;;  %1930 = vmatprep.mubr.msk.f32.mxu1 %vm2901_vm13, %v1326_v11 }
 0x39b   : > { %v1327_v37 = vadd.f32 %v1797_v31, %v1319_v34 }
 0x39d   : > { %1931 = vmatmul.mubr.msk.f32.vlgmr.msra.gmra.mrb[8].mxu1 %vm2902_vm14, %v1327_v37 }
 0x39e   : > { %1972 = vmatprep.mubr.msk.f32.mxu1 %vm2903_vm15, %v2120_v45 }
 0x470   : > { %v1932_v35 = vpop.f32.mrb[8].mxu1 }
 0x471   : > { %v1417_v9 = vadd.f32 %v1932_v35, %v1798_v14  ;;  %v1411_v18 = vpop.f32.mrb[9].mxu1 }
 0x472   : > { %v1412_v40 = vadd.f32 %v1798_v14, %v1411_v18 }
 0x473   : > { %v1421_v50 = vmax.f32 %v1417_v9, 0.0 }
 0x474   : > { %v1420_v48 = vmax.f32 %v1412_v40, 0.0 }
 0x476   : > { %1965 = vmatprep.mubr.f32.mxu0 %v1420_v48  ;;  %v1806_v48 = vld [vmem:[%s2883_s11] ss:$0 sm:$0xff] }
 0x477   : > { %1966 = vmatmul.mubr.f32.vlgmr.msra.gmra.mrb[2].mxu0 %v1421_v50 }
 0x54a   : > { %v1967_v42 = vpop.f32.mrb[2].mxu0 }
 0x54b   : > { %v1517_v52 = vadd.f32 %v1967_v42, %v1801_v51  ;;  %v1511_v49 = vpop.f32.mrb[3].mxu0  ;;  %v1807_v42 = vld [vmem:[%s2884_s12] ss:$0 sm:$0xff] }
 0x54c   : > { %v1512_v44 = vadd.f32 %v1801_v51, %v1511_v49 }
 0x54d   : > { %v1521_v25 = vadd.f32 %v1517_v52, %v1327_v37 }
 0x54e   : > { %v1520_v23 = vadd.f32 %v1512_v44, %v1326_v11 }
 0x54f   : > { %v1527_v53 = vsel %vm2904_vm2, %v1521_v25, 0.0 }
 0x550   : > { %1528 = vadd.xlane.f32.xlu1 %v1527_v53  ;;  %v1524_v54 = vsel %vm2905_vm3, %v1520_v23, 0.0 }
 0x551   : > { %1525 = vadd.xlane.f32.xlu0 %v1524_v54 }
 0x5dd   : > { %v1529_v55 = vpop.xlane.xlu1 %1528 }
 0x5de   : > { %v1531_v20 = vmul.f32 0.03125, %v1529_v55  ;;  %v1526_v56 = vpop.xlane.xlu0 %1525 }
 0x5df   : > { %v1530_v57 = vmul.f32 0.03125, %v1526_v56 }
 0x5e0   : > { %v1533_v58 = vsub.f32 %v1521_v25, %v1531_v20 }
 0x5e1   : > { %v1532_v59 = vsub.f32 %v1520_v23, %v1530_v57 }
 0x5e2   : > { %v1535_v32 = vmul.f32 %v1533_v58, %v1533_v58 }
 0x5e3   : > { %v1534_v61 = vmul.f32 %v1532_v59, %v1532_v59 }
 0x5e4   : > { %v1539_v33 = vsel %vm2906_vm4, %v1535_v32, 0.0 }
 0x5e5   : > { %1540 = vadd.xlane.f32.xlu1 %v1539_v33  ;;  %v1536_v63 = vsel %vm2907_vm5, %v1534_v61, 0.0 }
 0x5e6   : > { %1537 = vadd.xlane.f32.xlu0 %v1536_v63 }
 0x672   : > { %v1541_v26 = vpop.xlane.xlu1 %1540 }
 0x673   : > { %v1543_v0 = vmul.f32 0.03125, %v1541_v26  ;;  %v1538_v2 = vpop.xlane.xlu0 %1537 }
 0x674   : > { %v1542_v3 = vmul.f32 0.03125, %v1538_v2 }
 0x675   : > { %v1545_v21 = vadd.f32 1e-05, %v1543_v0 }
 0x676   : > { %v1544_v7 = vadd.f32 1e-05, %v1542_v3 }
 0x677   : > { %2112 = vrsqrt.f32 %v1545_v21 }
 0x678   : > { %2114 = vrsqrt.f32 %v1544_v7 }
 0x681   : > { %v2113_v60 = vpop.eup %2112 }
 0x682   : > { %v2115_v10 = vpop.eup %2114  ;;  %v1549_v6 = vmul.f32 %v2113_v60, %v1533_v58 }
 0x683   : > { %v1548_v15 = vmul.f32 %v2115_v10, %v1532_v59 }
 0x684   : > { %v1557_v16 = vmul.f32 %v1802_v19, %v1549_v6 }
 0x685   : > { %v1556_v39 = vmul.f32 %v1802_v19, %v1548_v15 }
 0x686   : > { %v1565_v27 = vadd.f32 %v1803_v12, %v1557_v16 }
 0x687   : > { %v1564_v29 = vadd.f32 %v1803_v12, %v1556_v39 }
 0x688   : > { %v1567_v38 = vadd.f32 %v2355_v22, %v1565_v27 }
 0x689   : > { %v1566_v13 = vadd.f32 %v1564_v29, %v2360_v24 }
 0x68b   : > { %v2051_v41 = vpack.c.bf16 %v1567_v38, %v1566_v13 }
 0x68d   : > { %2052 = vmatprep.subr.bf16.mxu1 %v2051_v41 }
 0x68e   : > { %2054 = vmatpush3.bf16.msra.mxu1 %v2051_v41 }
 0x691   : > { %1973 = vmatmul.mubr.msk.f32.vlgmr.msra.gmra.mrb[10].mxu1 %vm2908_vm6, %v2121_v28 }
 0x764   : > { %v1974_v46 = vpop.f32.mrb[10].mxu1 }
 0x765   : > { %v1644_v30 = vsub.f32 %v1567_v38, %v1974_v46  ;;  %v1634_v4 = vpop.f32.mrb[11].mxu1 }
 0x766   : > { %v1643_v1 = vsub.f32 %v1566_v13, %v1634_v4 }
 0x767   : > { %v1650_v8 = vsel %vm2909_vm7, %v1644_v30, 0.0 }
 0x768   : > { %1651 = vadd.xlane.f32.xlu1 %v1650_v8  ;;  %v1647_v22 = vsel %vm2910_vm8, %v1643_v1, 0.0 }
 0x769   : > { %1648 = vadd.xlane.f32.xlu0 %v1647_v22 }
 0x7f5   : > { %v1652_v24 = vpop.xlane.xlu1 %1651 }
 0x7f6   : > { %v1654_v31 = vmul.f32 0.03125, %v1652_v24  ;;  %v1649_v43 = vpop.xlane.xlu0 %1648 }
 0x7f7   : > { %v1653_v36 = vmul.f32 0.03125, %v1649_v43 }
 0x7f8   : > { %v1656_v62 = vsub.f32 %v1644_v30, %v1654_v31 }
 0x7f9   : > { %v1655_v11 = vsub.f32 %v1643_v1, %v1653_v36 }
 0x7fa   : > { %v1658_v34 = vmul.f32 %v1656_v62, %v1656_v62 }
 0x7fb   : > { %v1657_v37 = vmul.f32 %v1655_v11, %v1655_v11 }
 0x7fc   : > { %v1662_v45 = vsel %vm2911_vm9, %v1658_v34, 0.0 }
 0x7fd   : > { %1663 = vadd.xlane.f32.xlu1 %v1662_v45  ;;  %v1659_v47 = vsel %vm2912_vm10, %v1657_v37, 0.0 }
 0x7fe   : > { %1660 = vadd.xlane.f32.xlu0 %v1659_v47 }
 0x88a   : > { %v1664_v17 = vpop.xlane.xlu1 %1663 }
 0x88b   : > { %v1666_v5 = vmul.f32 0.03125, %v1664_v17  ;;  %v1661_v14 = vpop.xlane.xlu0 %1660 }
 0x88c   : > { %v1665_v35 = vmul.f32 0.03125, %v1661_v14 }
 0x88d   : > { %v1668_v9 = vadd.f32 1e-05, %v1666_v5 }
 0x88e   : > { %v1667_v18 = vadd.f32 1e-05, %v1665_v35 }
 0x88f   : > { %2116 = vrsqrt.f32 %v1668_v9 }
 0x890   : > { %2118 = vrsqrt.f32 %v1667_v18 }
 0x899   : > { %v2117_v40 = vpop.eup %2116 }
 0x89a   : > { %v2119_v50 = vpop.eup %2118  ;;  %v1672_v51 = vmul.f32 %v2117_v40, %v1656_v62 }
 0x89b   : > { %v1671_v52 = vmul.f32 %v2119_v50, %v1655_v11 }
 0x89c   : > { %v1680_v49 = vmul.f32 %v1806_v48, %v1672_v51 }
 0x89d   : > { %v1679_v44 = vmul.f32 %v1806_v48, %v1671_v52 }
 0x89e   : > { %v1688_v25 = vadd.f32 %v1807_v42, %v1680_v49 }
 0x89f   : > { %v1687_v23 = vadd.f32 %v1807_v42, %v1679_v44 }
 0x8a0   : > { %1690 = vst.msk [vmem:[%s433_s30 + $0x8] sm:$0xff] %vm2897_vm0, %v1688_v25 }
 0x8a1   : > { %1689 = vst.msk [vmem:[%s433_s30] sm:$0xff] %vm2913_vm1, %v1687_v23 }
 0x8a2   : > { %2135 = shalt.err (!%p2132_p3)
}
 0x8a3   : > { %s2136_s20 = scalar_lea.hbm %s2825_s1, 256  ;;  %s2140_s30 = scalar_lea.hbm %s2885_s13, 512 }
 0x8a4   : > { %p2137_p4 = scmp.ne.s32.totalorder %s2825_s1, %s2136_s20  ;;  %p2141_p9 = scmp.lt.u32.totalorder %s2825_s1, %s2885_s13 }
 0x8a5   : > { %p2142_p10 = scmp.lt.u32.totalorder %s2140_s30, %s2136_s20  ;;  %p2144_p12 = scmp.lt.u32.totalorder %s2136_s20, %s2825_s1 }
 0x8a6   : > { %p2138_p7 = pnand %p2137_p4, %p2297_p5 }
 0x8a7   : > { %p2143_p11 = por %p2142_p10, %p2141_p9 }
 0x8a8   : > { %p2139_p8 = pneg %p2138_p7 }
 0x8a9   : > { %p2145_p13 = por %p2144_p12, %p2143_p11 }
 0x8ab   : > { %p2146_p0 = pnand %p2145_p13, %p2139_p8 }
 0x8ad   : > { %2149 = shalt.err (!%p2146_p0)
}
 0x8ae   : > { %s2187_s27 = smov 128   ;;  %s2188_s21 = smov 8  }
 0x8af   : > { %2055 = dma.vmem_to_hbm [thread:$0]  (%p2297_p5), %s2827_s15, 256, %s2825_s1, %s2831_s29, %s2187_s27, %s2187_s27, %s2188_s21  }
 0x8b0 PF: > { %p2061_p1 = scmp.ge.s32.totalorder %s2184_s28, 2  ;;  %s1720_s22 = sand.u32 1, %s2172_s25  }
 0x8b1   : > { %s1721_s23 = scalar_lea.sflag [#allocation3], %s1720_s22 }
 0x8b2   : > { %p2058_p2 = pnand %p2061_p1, %p2301_p6 }
 0x8b4   : > { %2167 = dma.done.wait (!%p2058_p2), %s1721_s23, 256  }
 0x8b5   : > { %2169 = vsyncadd (!%p2058_p2), %s1721_s23, 4294967040  ;;  %s2914_s20 = sld [smem:[#allocation5_spill]]  ;;  %s2915_s27 = sld [smem:[#allocation6_spill]] }
 0x8b6   : > { %p23_p3 = scmp.ge.s32.totalorder %s2284_s14, 4   ;;  %s2916_s25 = smov %s2176_s26 }
 0x8b7   : > { %s2918_s28 = smov %s2284_s14 }
 0x8b8   :  { %25 = sbr.rel (!%p23_p3) target bundleno = 6 (0x6), region = 110 }
 0x8bb   : > { %s2917_s26 = smov %s2914_s20 }
 0x8bf   :  { %1726 = vsyncpa [#allocation3], 1 }
 0x8c0   :  { %1728 = vsyncpa [#allocation3 + $0x1], 1 }

</bundles_post_ra>
